<compile_context>
chip_gen: v7x
topology: tpu7x:2x2x1
jax: 0.10.0
libtpu: 0.0.40
codegen_flags: <defaults>
</compile_context>

<pallas_src>
import jax
import jax.numpy as jnp
from jax.experimental import pallas as pl
from jax.experimental.pallas import tpu as pltpu

_VMEM = pltpu.MemorySpace.VMEM


def _round_up(x, m):
    return ((x + m - 1) // m) * m


def _vmem_limit_bytes():
    """Generation-aware scoped-VMEM limit (v7x: ~45 MiB, v5e/v6e: ~90 MiB)."""
    cap = 64 << 20
    try:
        info = pltpu.get_tpu_info()
        cap = int(getattr(info, "vmem_capacity_bytes", cap) or cap)
    except Exception:
        pass
    return int(max(min(cap * 7 // 10, 96 << 20), 32 << 20))


def _plan_tiles(B, L1, L2, Hp, Vp, Cp, weight_bytes):
    """Pick the batch tile from the real per-row VMEM footprint."""
    limit = _vmem_limit_bytes()
    per_row = 0
    for L in (L1, L2):
        per_row += L * Hp * 2              # bf16 embedding scratch
        per_row += L * 3 * Hp * 4          # f32 wide-conv matmul output
        per_row += max(L - 2, 1) * Hp * 4  # f32 acc / relu
        per_row += L * 4 * 2               # int32 id block (double-buffered)
        per_row += Vp * 2                  # transient one-hot row
    per_row += Cp * 2 * 2                  # category block (double-buffered)
    per_row += Hp * 4 * 4 + 16             # pooled features / misc f32
    budget = max(limit - weight_bytes - (4 << 20), 1 << 20)
    tb = (budget // per_row) // 16 * 16
    tb = int(max(16, min(256, tb)))
    b_ru = _round_up(B, 16)
    tb = min(tb, b_ru)                     # don't over-pad tiny batches
    if b_ru >= 32:                         # >= 2 grid steps -> v7x 2-TC split
        tb = min(tb, max(16, _round_up((b_ru + 1) // 2, 16)))
    b_pad = _round_up(B, tb)
    return int(tb), int(b_pad), int(limit)


def _pad_rows(x, n):
    if x.shape[0] == n:
        return x
    return jnp.pad(x, [(0, n - x.shape[0])] + [(0, 0)] * (x.ndim - 1))


# ----------------------------------------------------------------------------
# Fused kernel: in-kernel embedding gather + conv + relu + mean for both text
# inputs, category linear + relu, folded (inter+final) head — per batch tile.
# ----------------------------------------------------------------------------
def fused_kernel(ids1_ref, ids2_ref, cat_ref,
                 tab1_ref, cw1_ref, cb1_ref,
                 tab2_ref, cw2_ref, cb2_ref,
                 catw_ref, catb_ref,
                 wct_ref, wcf_ref, wcc_ref, wcb_ref,
                 out_ref,
                 emb1_scr, emb2_scr):

    def encode(ids_ref, tab_ref, cw_ref, cb_ref, emb_scr):
        TB, L = ids_ref.shape
        Vp, Hp = tab_ref.shape
        K = cw_ref.shape[1] // Hp
        Lout = L - K + 1                          # 'valid' conv (nn.Conv1d default)

        ids = ids_ref[...]                        # (TB, L) int32
        tab = tab_ref[...]                        # (Vp, Hp) bf16, VMEM-resident
        lane_iota = jax.lax.broadcasted_iota(jnp.int32, (TB, Vp), 1)

        # In-kernel embedding gather: one-hot MXU matmul per time step (keeps
        # everything 2D / lane-dense; no (B, L, H) activation touches HBM).
        for t in range(L):
            onehot = (ids[:, t:t + 1] == lane_iota).astype(jnp.bfloat16)   # (TB, Vp)
            emb_scr[t] = jnp.dot(onehot, tab,
                                 preferred_element_type=jnp.float32
                                 ).astype(jnp.bfloat16)                    # (TB, Hp)

        # Conv1d(kernel=3) as ONE wide contraction: (L*TB, Hp) @ (Hp, K*Hp).
        emb2d = emb_scr[...].reshape(L * TB, Hp)          # free: TB % 16 == 0
        y = jnp.dot(emb2d, cw_ref[...], preferred_element_type=jnp.float32)
        y = y.reshape(L, TB, K * Hp)                      # free: TB % 8 == 0

        # Time shifts = slices along the untiled leading axis + 128-aligned
        # lane blocks -> no sublane relayout, no x_cat concat.
        acc = cb_ref[...]                                 # (1, Hp) f32 bias
        for k in range(K):
            acc = acc + y[k:k + Lout, :, k * Hp:(k + 1) * Hp]
        z = jnp.maximum(acc, 0.0)                         # ReLU, f32 epilogue (VPU)
        # AdaptiveAvgPool1d(1) + Flatten == mean over time.
        return jnp.sum(z, axis=0) * (1.0 / Lout)          # (TB, Hp) f32

    title = encode(ids1_ref, tab1_ref, cw1_ref, cb1_ref, emb1_scr)
    full = encode(ids2_ref, tab2_ref, cw2_ref, cb2_ref, emb2_scr)

    cat = jnp.maximum(
        jnp.dot(cat_ref[...], catw_ref[...], preferred_element_type=jnp.float32)
        + catb_ref[...], 0.0)                             # (TB, Hp) f32

    # inter_dense + final_dense folded offline: out = feats . w_fold + b_fold,
    # done block-wise so no concat is needed (VPU multiply + lane reduce).
    out_ref[...] = (
        jnp.sum(title * wct_ref[...], axis=-1, keepdims=True)
        + jnp.sum(full * wcf_ref[...], axis=-1, keepdims=True)
        + jnp.sum(cat * wcc_ref[...], axis=-1, keepdims=True)
        + wcb_ref[...])                                   # (TB, 1) f32


# ----------------------------------------------------------------------------
# Wrapper: pad/fold torch-layout params, tile the batch, launch the kernel.
# ----------------------------------------------------------------------------
def three_inputs_net(params, input1, input2, input3):
    """input1/input2: int token ids (B, L1)/(B, L2); input3: f32 (B, n_cat)."""
    B, L1 = input1.shape
    _, L2 = input2.shape
    C = input3.shape[1]
    V, H = params["title_emb"].shape
    K = params["title_conv_w"].shape[2]
    assert L1 >= K and L2 >= K, "sequence shorter than conv kernel width"

    Hp = _round_up(H, 128)      # lane-dense feature dim
    Vp = _round_up(V, 128)      # lane-dense one-hot / vocab dim
    Cp = _round_up(C, 128)      # lane-dense category dim

    def pad2(x, r, c):
        return jnp.pad(x, ((0, r - x.shape[0]), (0, c - x.shape[1])))

    def conv_wide(w):           # torch (H_out, H_in, K) -> (Hp, K*Hp) bf16
        blocks = [pad2(w[:, :, k].T, Hp, Hp) for k in range(K)]
        return jnp.concatenate(blocks, axis=1).astype(jnp.bfloat16)

    def row(v, n):              # 1-D -> (1, n) f32, zero-padded
        return jnp.pad(v.astype(jnp.float32), (0, n - v.shape[0])).reshape(1, n)

    tab1 = pad2(params["title_emb"], Vp, Hp).astype(jnp.bfloat16)
    tab2 = pad2(params["full_emb"], Vp, Hp).astype(jnp.bfloat16)
    cw1 = conv_wide(params["title_conv_w"]);  cb1 = row(params["title_conv_b"], Hp)
    cw2 = conv_wide(params["full_conv_w"]);   cb2 = row(params["full_conv_b"], Hp)
    catw = pad2(params["cat_w"].T, Cp, Hp).astype(jnp.bfloat16)
    catb = row(params["cat_b"], Hp)

    # Fold final_dense into inter_dense (no activation between them in torch).
    fw = params["final_w"].astype(jnp.float32)                         # (1, 2H)
    folded_w = (fw @ params["inter_w"].astype(jnp.float32))[0]         # (3H,)
    folded_b = fw @ params["inter_b"].astype(jnp.float32) + params["final_b"]
    wct = row(folded_w[0:H], Hp)
    wcf = row(folded_w[H:2 * H], Hp)
    wcc = row(folded_w[2 * H:3 * H], Hp)
    wcb = folded_b.reshape(1, 1).astype(jnp.float32)

    weight_bytes = int(
        (tab1.size + tab2.size + cw1.size + cw2.size + catw.size) * 2
        + (cb1.size + cb2.size + catb.size + wct.size + wcf.size
           + wcc.size + wcb.size) * 4)

    TB, B_pad, vmem_limit = _plan_tiles(B, L1, L2, Hp, Vp, Cp, weight_bytes)

    ids1 = _pad_rows(input1.astype(jnp.int32), B_pad)
    ids2 = _pad_rows(input2.astype(jnp.int32), B_pad)
    cat_in = jnp.pad(_pad_rows(input3.astype(jnp.float32), B_pad),
                     ((0, 0), (0, Cp - C))).astype(jnp.bfloat16)

    wspec = pl.BlockSpec(memory_space=_VMEM)   # whole-array VMEM-resident weights
    grid = (B_pad // TB,)

    out = pl.pallas_call(
        fused_kernel,
        out_shape=jax.ShapeDtypeStruct((B_pad, 1), jnp.float32),
        grid_spec=pltpu.PrefetchScalarGridSpec(
            num_scalar_prefetch=0,
            grid=grid,
            in_specs=[
                pl.BlockSpec((TB, L1), lambda i: (i, 0)),    # title ids
                pl.BlockSpec((TB, L2), lambda i: (i, 0)),    # full ids
                pl.BlockSpec((TB, Cp), lambda i: (i, 0)),    # category features
                wspec, wspec, wspec,                          # tab1, conv1 w/b
                wspec, wspec, wspec,                          # tab2, conv2 w/b
                wspec, wspec,                                 # cat w/b
                wspec, wspec, wspec, wspec,                   # folded head
            ],
            out_specs=pl.BlockSpec((TB, 1), lambda i: (i, 0)),
            scratch_shapes=[
                pltpu.VMEM((L1, TB, Hp), jnp.bfloat16),       # title emb scratch
                pltpu.VMEM((L2, TB, Hp), jnp.bfloat16),       # full emb scratch
            ],
        ),
        compiler_params=pltpu.CompilerParams(
            dimension_semantics=("parallel",),
            vmem_limit_bytes=vmem_limit,
        ),
    )(ids1, ids2, cat_in,
      tab1, cw1, cb1, tab2, cw2, cb2,
      catw, catb, wct, wcf, wcc, wcb)

    return out[:B]


# ----------------------------------------------------------------------------
# Parameters (torch layouts) and pure-jnp f32 reference for verification.
# ----------------------------------------------------------------------------
def make_params(key, n_tokens, n_cat_features, hid_size):
    H = hid_size
    ks = jax.random.split(key, 12)

    def rnd(k, shape, scale):
        return scale * jax.random.normal(k, shape, jnp.float32)

    return {
        "title_emb": rnd(ks[0], (n_tokens, H), 1.0),
        "full_emb": rnd(ks[1], (n_tokens, H), 1.0),
        "title_conv_w": rnd(ks[2], (H, H, 3), 0.15),     # torch Conv1d (out, in, k)
        "title_conv_b": rnd(ks[3], (H,), 0.1),
        "full_conv_w": rnd(ks[4], (H, H, 3), 0.15),
        "full_conv_b": rnd(ks[5], (H,), 0.1),
        "cat_w": rnd(ks[6], (H, n_cat_features), 0.3),   # torch Linear (out, in)
        "cat_b": rnd(ks[7], (H,), 0.1),
        "inter_w": rnd(ks[8], (2 * H, 3 * H), 0.15),
        "inter_b": rnd(ks[9], (2 * H,), 0.1),
        "final_w": rnd(ks[10], (1, 2 * H), 0.2),
        "final_b": rnd(ks[11], (1,), 0.1),
    }


def _reference(params, input1, input2, input3):
    """Pure-jnp f32 replica of the torch ThreeInputsNet forward."""
    def enc(tab, ids, w, b):
        emb = tab[ids]                                   # (B, L, H)
        K = w.shape[2]
        Lout = emb.shape[1] - K + 1
        acc = b[None, None, :]
        for k in range(K):
            acc = acc + jnp.einsum("bli,oi->blo", emb[:, k:k + Lout, :], w[:, :, k])
        return jnp.mean(jnp.maximum(acc, 0.0), axis=1)   # (B, H)

    title = enc(params["title_emb"], input1,
                params["title_conv_w"], params["title_conv_b"])
    full = enc(params["full_emb"], input2,
               params["full_conv_w"], params["full_conv_b"])
    cat = jnp.maximum(input3 @ params["cat_w"].T + params["cat_b"], 0.0)
    x = jnp.concatenate([title, full, cat], axis=1)
    x = x @ params["inter_w"].T + params["inter_b"]
    return x @ params["final_w"].T + params["final_b"]


if __name__ == "__main__":
    B = 2
    n_tokens = 50
    hid_size = 32
    n_cat_features = 6
    L_title = 8
    L_full = 12

    key = jax.random.PRNGKey(0)
    k_p, k_i1, k_i2, k_i3 = jax.random.split(key, 4)

    params = make_params(k_p, n_tokens, n_cat_features, hid_size)
    input1 = jax.random.randint(k_i1, (B, L_title), 0, n_tokens, dtype=jnp.int32)
    input2 = jax.random.randint(k_i2, (B, L_full), 0, n_tokens, dtype=jnp.int32)
    input3 = jax.random.normal(k_i3, (B, n_cat_features), jnp.float32)

    fwd = jax.jit(three_inputs_net)
    out = jax.block_until_ready(fwd(params, input1, input2, input3))
    assert out.shape == (B, 1), out.shape

    ref = _reference(params, input1, input2, input3)
    assert jnp.allclose(out, ref, atol=5e-2, rtol=5e-2), (out, ref)

    print("KERNEL_OK")
</pallas_src>

<mosaic_0001>
module attributes {stable_mosaic.version = 11 : i64} {
  func.func @fused_kernel(%arg0: i32, %arg1: memref<16x8xi32, #tpu.memory_space<vmem>>, %arg2: memref<16x12xi32, #tpu.memory_space<vmem>>, %arg3: memref<16x128xbf16, #tpu.memory_space<vmem>>, %arg4: memref<128x128xbf16, #tpu.memory_space<vmem>>, %arg5: memref<128x384xbf16, #tpu.memory_space<vmem>>, %arg6: memref<1x128xf32, #tpu.memory_space<vmem>>, %arg7: memref<128x128xbf16, #tpu.memory_space<vmem>>, %arg8: memref<128x384xbf16, #tpu.memory_space<vmem>>, %arg9: memref<1x128xf32, #tpu.memory_space<vmem>>, %arg10: memref<128x128xbf16, #tpu.memory_space<vmem>>, %arg11: memref<1x128xf32, #tpu.memory_space<vmem>>, %arg12: memref<1x128xf32, #tpu.memory_space<vmem>>, %arg13: memref<1x128xf32, #tpu.memory_space<vmem>>, %arg14: memref<1x128xf32, #tpu.memory_space<vmem>>, %arg15: memref<1x1xf32, #tpu.memory_space<vmem>>, %arg16: memref<16x1xf32, #tpu.memory_space<vmem>>, %arg17: memref<8x16x128xbf16, #tpu.memory_space<vmem>>, %arg18: memref<12x16x128xbf16, #tpu.memory_space<vmem>>) attributes {dimension_semantics = [#tpu.dimension_semantics<parallel>], iteration_bounds = array<i64: 1>, scalar_prefetch = 0 : i64, scratch_operands = 2 : i64, tpu.core_type = #tpu.core_type<tc>, window_params = [{transform_indices = @transform_0, window_bounds = array<i64: 16, 8>}, {transform_indices = @transform_1, window_bounds = array<i64: 16, 12>}, {transform_indices = @transform_2, window_bounds = array<i64: 16, 128>}, {pipeline_mode = #tpu.pipeline_mode<synchronous>, transform_indices = @transform_3, window_bounds = array<i64: 128, 128>}, {pipeline_mode = #tpu.pipeline_mode<synchronous>, transform_indices = @transform_4, window_bounds = array<i64: 128, 384>}, {pipeline_mode = #tpu.pipeline_mode<synchronous>, transform_indices = @transform_5, window_bounds = array<i64: 1, 128>}, {pipeline_mode = #tpu.pipeline_mode<synchronous>, transform_indices = @transform_6, window_bounds = array<i64: 128, 128>}, {pipeline_mode = #tpu.pipeline_mode<synchronous>, transform_indices = @transform_7, window_bounds = array<i64: 128, 384>}, {pipeline_mode = #tpu.pipeline_mode<synchronous>, transform_indices = @transform_8, window_bounds = array<i64: 1, 128>}, {pipeline_mode = #tpu.pipeline_mode<synchronous>, transform_indices = @transform_9, window_bounds = array<i64: 128, 128>}, {pipeline_mode = #tpu.pipeline_mode<synchronous>, transform_indices = @transform_10, window_bounds = array<i64: 1, 128>}, {pipeline_mode = #tpu.pipeline_mode<synchronous>, transform_indices = @transform_11, window_bounds = array<i64: 1, 128>}, {pipeline_mode = #tpu.pipeline_mode<synchronous>, transform_indices = @transform_12, window_bounds = array<i64: 1, 128>}, {pipeline_mode = #tpu.pipeline_mode<synchronous>, transform_indices = @transform_13, window_bounds = array<i64: 1, 128>}, {pipeline_mode = #tpu.pipeline_mode<synchronous>, transform_indices = @transform_14, window_bounds = array<i64: 1, 1>}, {transform_indices = @transform_15, window_bounds = array<i64: 16, 1>}]} {
    %c0 = arith.constant 0 : index
    %c0_0 = arith.constant 0 : index
    %0 = vector.load %arg1[%c0, %c0_0] : memref<16x8xi32, #tpu.memory_space<vmem>>, vector<16x8xi32>
    %c0_1 = arith.constant 0 : index
    %c0_2 = arith.constant 0 : index
    %1 = vector.load %arg4[%c0_1, %c0_2] : memref<128x128xbf16, #tpu.memory_space<vmem>>, vector<128x128xbf16>
    %2 = tpu.iota {dimensions = array<i32: 1>} : vector<16x128xi32>
    %3 = vector.extract_strided_slice %0 {offsets = [0, 0], sizes = [16, 1], strides = [1, 1]} : vector<16x8xi32> to vector<16x1xi32>
    %4 = vector.broadcast %3 : vector<16x1xi32> to vector<16x128xi32>
    %5 = arith.cmpi eq, %4, %2 : vector<16x128xi32>
    %6 = arith.extui %5 : vector<16x128xi1> to vector<16x128xi32>
    %7 = arith.sitofp %6 : vector<16x128xi32> to vector<16x128xf32>
    %8 = arith.truncf %7 : vector<16x128xf32> to vector<16x128xbf16>
    %cst = arith.constant dense<0.000000e+00> : vector<16x128xf32>
    %9 = tpu.matmul %8, %1, %cst {dimension_numbers = #tpu.dot_dimension_numbers<[1], [0], [0], [1], [0, 0, 1, 1], [], []>} : vector<16x128xbf16>, vector<128x128xbf16>, vector<16x128xf32> -> vector<16x128xf32>
    %10 = arith.truncf %9 : vector<16x128xf32> to vector<16x128xbf16>
    %c0_3 = arith.constant 0 : index
    %c0_4 = arith.constant 0 : index
    %c0_5 = arith.constant 0 : index
    %11 = vector.load %arg17[%c0_3, %c0_4, %c0_5] : memref<8x16x128xbf16, #tpu.memory_space<vmem>>, vector<1x16x128xbf16>
    %12 = vector.shape_cast %11 : vector<1x16x128xbf16> to vector<16x128xbf16>
    %13 = vector.shape_cast %10 : vector<16x128xbf16> to vector<1x16x128xbf16>
    tpu.vector_store %arg17[%c0_3, %c0_4, %c0_5], %13 {strides = array<i32>} : memref<8x16x128xbf16, #tpu.memory_space<vmem>>, vector<1x16x128xbf16>,
    %14 = vector.extract_strided_slice %0 {offsets = [0, 1], sizes = [16, 1], strides = [1, 1]} : vector<16x8xi32> to vector<16x1xi32>
    %15 = vector.broadcast %14 : vector<16x1xi32> to vector<16x128xi32>
    %16 = arith.cmpi eq, %15, %2 : vector<16x128xi32>
    %17 = arith.extui %16 : vector<16x128xi1> to vector<16x128xi32>
    %18 = arith.sitofp %17 : vector<16x128xi32> to vector<16x128xf32>
    %19 = arith.truncf %18 : vector<16x128xf32> to vector<16x128xbf16>
    %cst_6 = arith.constant dense<0.000000e+00> : vector<16x128xf32>
    %20 = tpu.matmul %19, %1, %cst_6 {dimension_numbers = #tpu.dot_dimension_numbers<[1], [0], [0], [1], [0, 0, 1, 1], [], []>} : vector<16x128xbf16>, vector<128x128xbf16>, vector<16x128xf32> -> vector<16x128xf32>
    %21 = arith.truncf %20 : vector<16x128xf32> to vector<16x128xbf16>
    %c1 = arith.constant 1 : index
    %c0_7 = arith.constant 0 : index
    %c0_8 = arith.constant 0 : index
    %22 = vector.load %arg17[%c1, %c0_7, %c0_8] : memref<8x16x128xbf16, #tpu.memory_space<vmem>>, vector<1x16x128xbf16>
    %23 = vector.shape_cast %22 : vector<1x16x128xbf16> to vector<16x128xbf16>
    %24 = vector.shape_cast %21 : vector<16x128xbf16> to vector<1x16x128xbf16>
    tpu.vector_store %arg17[%c1, %c0_7, %c0_8], %24 {strides = array<i32>} : memref<8x16x128xbf16, #tpu.memory_space<vmem>>, vector<1x16x128xbf16>,
    %25 = vector.extract_strided_slice %0 {offsets = [0, 2], sizes = [16, 1], strides = [1, 1]} : vector<16x8xi32> to vector<16x1xi32>
    %26 = vector.broadcast %25 : vector<16x1xi32> to vector<16x128xi32>
    %27 = arith.cmpi eq, %26, %2 : vector<16x128xi32>
    %28 = arith.extui %27 : vector<16x128xi1> to vector<16x128xi32>
    %29 = arith.sitofp %28 : vector<16x128xi32> to vector<16x128xf32>
    %30 = arith.truncf %29 : vector<16x128xf32> to vector<16x128xbf16>
    %cst_9 = arith.constant dense<0.000000e+00> : vector<16x128xf32>
    %31 = tpu.matmul %30, %1, %cst_9 {dimension_numbers = #tpu.dot_dimension_numbers<[1], [0], [0], [1], [0, 0, 1, 1], [], []>} : vector<16x128xbf16>, vector<128x128xbf16>, vector<16x128xf32> -> vector<16x128xf32>
    %32 = arith.truncf %31 : vector<16x128xf32> to vector<16x128xbf16>
    %c2 = arith.constant 2 : index
    %c0_10 = arith.constant 0 : index
    %c0_11 = arith.constant 0 : index
    %33 = vector.load %arg17[%c2, %c0_10, %c0_11] : memref<8x16x128xbf16, #tpu.memory_space<vmem>>, vector<1x16x128xbf16>
    %34 = vector.shape_cast %33 : vector<1x16x128xbf16> to vector<16x128xbf16>
    %35 = vector.shape_cast %32 : vector<16x128xbf16> to vector<1x16x128xbf16>
    tpu.vector_store %arg17[%c2, %c0_10, %c0_11], %35 {strides = array<i32>} : memref<8x16x128xbf16, #tpu.memory_space<vmem>>, vector<1x16x128xbf16>,
    %36 = vector.extract_strided_slice %0 {offsets = [0, 3], sizes = [16, 1], strides = [1, 1]} : vector<16x8xi32> to vector<16x1xi32>
    %37 = vector.broadcast %36 : vector<16x1xi32> to vector<16x128xi32>
    %38 = arith.cmpi eq, %37, %2 : vector<16x128xi32>
    %39 = arith.extui %38 : vector<16x128xi1> to vector<16x128xi32>
    %40 = arith.sitofp %39 : vector<16x128xi32> to vector<16x128xf32>
    %41 = arith.truncf %40 : vector<16x128xf32> to vector<16x128xbf16>
    %cst_12 = arith.constant dense<0.000000e+00> : vector<16x128xf32>
    %42 = tpu.matmul %41, %1, %cst_12 {dimension_numbers = #tpu.dot_dimension_numbers<[1], [0], [0], [1], [0, 0, 1, 1], [], []>} : vector<16x128xbf16>, vector<128x128xbf16>, vector<16x128xf32> -> vector<16x128xf32>
    %43 = arith.truncf %42 : vector<16x128xf32> to vector<16x128xbf16>
    %c3 = arith.constant 3 : index
    %c0_13 = arith.constant 0 : index
    %c0_14 = arith.constant 0 : index
    %44 = vector.load %arg17[%c3, %c0_13, %c0_14] : memref<8x16x128xbf16, #tpu.memory_space<vmem>>, vector<1x16x128xbf16>
    %45 = vector.shape_cast %44 : vector<1x16x128xbf16> to vector<16x128xbf16>
    %46 = vector.shape_cast %43 : vector<16x128xbf16> to vector<1x16x128xbf16>
    tpu.vector_store %arg17[%c3, %c0_13, %c0_14], %46 {strides = array<i32>} : memref<8x16x128xbf16, #tpu.memory_space<vmem>>, vector<1x16x128xbf16>,
    %47 = vector.extract_strided_slice %0 {offsets = [0, 4], sizes = [16, 1], strides = [1, 1]} : vector<16x8xi32> to vector<16x1xi32>
    %48 = vector.broadcast %47 : vector<16x1xi32> to vector<16x128xi32>
    %49 = arith.cmpi eq, %48, %2 : vector<16x128xi32>
    %50 = arith.extui %49 : vector<16x128xi1> to vector<16x128xi32>
    %51 = arith.sitofp %50 : vector<16x128xi32> to vector<16x128xf32>
    %52 = arith.truncf %51 : vector<16x128xf32> to vector<16x128xbf16>
    %cst_15 = arith.constant dense<0.000000e+00> : vector<16x128xf32>
    %53 = tpu.matmul %52, %1, %cst_15 {dimension_numbers = #tpu.dot_dimension_numbers<[1], [0], [0], [1], [0, 0, 1, 1], [], []>} : vector<16x128xbf16>, vector<128x128xbf16>, vector<16x128xf32> -> vector<16x128xf32>
    %54 = arith.truncf %53 : vector<16x128xf32> to vector<16x128xbf16>
    %c4 = arith.constant 4 : index
    %c0_16 = arith.constant 0 : index
    %c0_17 = arith.constant 0 : index
    %55 = vector.load %arg17[%c4, %c0_16, %c0_17] : memref<8x16x128xbf16, #tpu.memory_space<vmem>>, vector<1x16x128xbf16>
    %56 = vector.shape_cast %55 : vector<1x16x128xbf16> to vector<16x128xbf16>
    %57 = vector.shape_cast %54 : vector<16x128xbf16> to vector<1x16x128xbf16>
    tpu.vector_store %arg17[%c4, %c0_16, %c0_17], %57 {strides = array<i32>} : memref<8x16x128xbf16, #tpu.memory_space<vmem>>, vector<1x16x128xbf16>,
    %58 = vector.extract_strided_slice %0 {offsets = [0, 5], sizes = [16, 1], strides = [1, 1]} : vector<16x8xi32> to vector<16x1xi32>
    %59 = vector.broadcast %58 : vector<16x1xi32> to vector<16x128xi32>
    %60 = arith.cmpi eq, %59, %2 : vector<16x128xi32>
    %61 = arith.extui %60 : vector<16x128xi1> to vector<16x128xi32>
    %62 = arith.sitofp %61 : vector<16x128xi32> to vector<16x128xf32>
    %63 = arith.truncf %62 : vector<16x128xf32> to vector<16x128xbf16>
    %cst_18 = arith.constant dense<0.000000e+00> : vector<16x128xf32>
    %64 = tpu.matmul %63, %1, %cst_18 {dimension_numbers = #tpu.dot_dimension_numbers<[1], [0], [0], [1], [0, 0, 1, 1], [], []>} : vector<16x128xbf16>, vector<128x128xbf16>, vector<16x128xf32> -> vector<16x128xf32>
    %65 = arith.truncf %64 : vector<16x128xf32> to vector<16x128xbf16>
    %c5 = arith.constant 5 : index
    %c0_19 = arith.constant 0 : index
    %c0_20 = arith.constant 0 : index
    %66 = vector.load %arg17[%c5, %c0_19, %c0_20] : memref<8x16x128xbf16, #tpu.memory_space<vmem>>, vector<1x16x128xbf16>
    %67 = vector.shape_cast %66 : vector<1x16x128xbf16> to vector<16x128xbf16>
    %68 = vector.shape_cast %65 : vector<16x128xbf16> to vector<1x16x128xbf16>
    tpu.vector_store %arg17[%c5, %c0_19, %c0_20], %68 {strides = array<i32>} : memref<8x16x128xbf16, #tpu.memory_space<vmem>>, vector<1x16x128xbf16>,
    %69 = vector.extract_strided_slice %0 {offsets = [0, 6], sizes = [16, 1], strides = [1, 1]} : vector<16x8xi32> to vector<16x1xi32>
    %70 = vector.broadcast %69 : vector<16x1xi32> to vector<16x128xi32>
    %71 = arith.cmpi eq, %70, %2 : vector<16x128xi32>
    %72 = arith.extui %71 : vector<16x128xi1> to vector<16x128xi32>
    %73 = arith.sitofp %72 : vector<16x128xi32> to vector<16x128xf32>
    %74 = arith.truncf %73 : vector<16x128xf32> to vector<16x128xbf16>
    %cst_21 = arith.constant dense<0.000000e+00> : vector<16x128xf32>
    %75 = tpu.matmul %74, %1, %cst_21 {dimension_numbers = #tpu.dot_dimension_numbers<[1], [0], [0], [1], [0, 0, 1, 1], [], []>} : vector<16x128xbf16>, vector<128x128xbf16>, vector<16x128xf32> -> vector<16x128xf32>
    %76 = arith.truncf %75 : vector<16x128xf32> to vector<16x128xbf16>
    %c6 = arith.constant 6 : index
    %c0_22 = arith.constant 0 : index
    %c0_23 = arith.constant 0 : index
    %77 = vector.load %arg17[%c6, %c0_22, %c0_23] : memref<8x16x128xbf16, #tpu.memory_space<vmem>>, vector<1x16x128xbf16>
    %78 = vector.shape_cast %77 : vector<1x16x128xbf16> to vector<16x128xbf16>
    %79 = vector.shape_cast %76 : vector<16x128xbf16> to vector<1x16x128xbf16>
    tpu.vector_store %arg17[%c6, %c0_22, %c0_23], %79 {strides = array<i32>} : memref<8x16x128xbf16, #tpu.memory_space<vmem>>, vector<1x16x128xbf16>,
    %80 = vector.extract_strided_slice %0 {offsets = [0, 7], sizes = [16, 1], strides = [1, 1]} : vector<16x8xi32> to vector<16x1xi32>
    %81 = vector.broadcast %80 : vector<16x1xi32> to vector<16x128xi32>
    %82 = arith.cmpi eq, %81, %2 : vector<16x128xi32>
    %83 = arith.extui %82 : vector<16x128xi1> to vector<16x128xi32>
    %84 = arith.sitofp %83 : vector<16x128xi32> to vector<16x128xf32>
    %85 = arith.truncf %84 : vector<16x128xf32> to vector<16x128xbf16>
    %cst_24 = arith.constant dense<0.000000e+00> : vector<16x128xf32>
    %86 = tpu.matmul %85, %1, %cst_24 {dimension_numbers = #tpu.dot_dimension_numbers<[1], [0], [0], [1], [0, 0, 1, 1], [], []>} : vector<16x128xbf16>, vector<128x128xbf16>, vector<16x128xf32> -> vector<16x128xf32>
    %87 = arith.truncf %86 : vector<16x128xf32> to vector<16x128xbf16>
    %c7 = arith.constant 7 : index
    %c0_25 = arith.constant 0 : index
    %c0_26 = arith.constant 0 : index
    %88 = vector.load %arg17[%c7, %c0_25, %c0_26] : memref<8x16x128xbf16, #tpu.memory_space<vmem>>, vector<1x16x128xbf16>
    %89 = vector.shape_cast %88 : vector<1x16x128xbf16> to vector<16x128xbf16>
    %90 = vector.shape_cast %87 : vector<16x128xbf16> to vector<1x16x128xbf16>
    tpu.vector_store %arg17[%c7, %c0_25, %c0_26], %90 {strides = array<i32>} : memref<8x16x128xbf16, #tpu.memory_space<vmem>>, vector<1x16x128xbf16>,
    %c0_27 = arith.constant 0 : index
    %c0_28 = arith.constant 0 : index
    %c0_29 = arith.constant 0 : index
    %91 = vector.load %arg17[%c0_27, %c0_28, %c0_29] : memref<8x16x128xbf16, #tpu.memory_space<vmem>>, vector<8x16x128xbf16>
    %92 = vector.shape_cast %91 : vector<8x16x128xbf16> to vector<128x128xbf16>
    %c0_30 = arith.constant 0 : index
    %c0_31 = arith.constant 0 : index
    %93 = vector.load %arg5[%c0_30, %c0_31] : memref<128x384xbf16, #tpu.memory_space<vmem>>, vector<128x384xbf16>
    %cst_32 = arith.constant dense<0.000000e+00> : vector<128x384xf32>
    %94 = tpu.matmul %92, %93, %cst_32 {dimension_numbers = #tpu.dot_dimension_numbers<[1], [0], [0], [1], [0, 0, 1, 1], [], []>} : vector<128x128xbf16>, vector<128x384xbf16>, vector<128x384xf32> -> vector<128x384xf32>
    %95 = vector.shape_cast %94 : vector<128x384xf32> to vector<8x16x384xf32>
    %c0_33 = arith.constant 0 : index
    %c0_34 = arith.constant 0 : index
    %96 = vector.load %arg6[%c0_33, %c0_34] : memref<1x128xf32, #tpu.memory_space<vmem>>, vector<1x128xf32>
    %97 = vector.extract_strided_slice %95 {offsets = [0, 0, 0], sizes = [6, 16, 128], strides = [1, 1, 1]} : vector<8x16x384xf32> to vector<6x16x128xf32>
    %98 = vector.shape_cast %96 : vector<1x128xf32> to vector<1x1x128xf32>
    %99 = vector.broadcast %98 : vector<1x1x128xf32> to vector<6x16x128xf32>
    %100 = arith.addf %99, %97 : vector<6x16x128xf32>
    %101 = vector.extract_strided_slice %95 {offsets = [1, 0, 128], sizes = [6, 16, 128], strides = [1, 1, 1]} : vector<8x16x384xf32> to vector<6x16x128xf32>
    %102 = arith.addf %100, %101 : vector<6x16x128xf32>
    %103 = vector.extract_strided_slice %95 {offsets = [2, 0, 256], sizes = [6, 16, 128], strides = [1, 1, 1]} : vector<8x16x384xf32> to vector<6x16x128xf32>
    %104 = arith.addf %102, %103 : vector<6x16x128xf32>
    %cst_35 = arith.constant 0.000000e+00 : f32
    %105 = vector.broadcast %cst_35 : f32 to vector<6x16x128xf32>
    %106 = arith.maximumf %104, %105 : vector<6x16x128xf32>
    %cst_36 = arith.constant dense<0.000000e+00> : vector<16x128xf32>
    %107 = vector.multi_reduction <add>, %106, %cst_36 [0] : vector<6x16x128xf32> to vector<16x128xf32>
    %cst_37 = arith.constant 0.166666672 : f32
    %108 = vector.broadcast %cst_37 : f32 to vector<16x128xf32>
    %109 = arith.mulf %107, %108 : vector<16x128xf32>
    %c0_38 = arith.constant 0 : index
    %c0_39 = arith.constant 0 : index
    %110 = vector.load %arg2[%c0_38, %c0_39] : memref<16x12xi32, #tpu.memory_space<vmem>>, vector<16x12xi32>
    %c0_40 = arith.constant 0 : index
    %c0_41 = arith.constant 0 : index
    %111 = vector.load %arg7[%c0_40, %c0_41] : memref<128x128xbf16, #tpu.memory_space<vmem>>, vector<128x128xbf16>
    %112 = tpu.iota {dimensions = array<i32: 1>} : vector<16x128xi32>
    %113 = vector.extract_strided_slice %110 {offsets = [0, 0], sizes = [16, 1], strides = [1, 1]} : vector<16x12xi32> to vector<16x1xi32>
    %114 = vector.broadcast %113 : vector<16x1xi32> to vector<16x128xi32>
    %115 = arith.cmpi eq, %114, %112 : vector<16x128xi32>
    %116 = arith.extui %115 : vector<16x128xi1> to vector<16x128xi32>
    %117 = arith.sitofp %116 : vector<16x128xi32> to vector<16x128xf32>
    %118 = arith.truncf %117 : vector<16x128xf32> to vector<16x128xbf16>
    %cst_42 = arith.constant dense<0.000000e+00> : vector<16x128xf32>
    %119 = tpu.matmul %118, %111, %cst_42 {dimension_numbers = #tpu.dot_dimension_numbers<[1], [0], [0], [1], [0, 0, 1, 1], [], []>} : vector<16x128xbf16>, vector<128x128xbf16>, vector<16x128xf32> -> vector<16x128xf32>
    %120 = arith.truncf %119 : vector<16x128xf32> to vector<16x128xbf16>
    %c0_43 = arith.constant 0 : index
    %c0_44 = arith.constant 0 : index
    %c0_45 = arith.constant 0 : index
    %121 = vector.load %arg18[%c0_43, %c0_44, %c0_45] : memref<12x16x128xbf16, #tpu.memory_space<vmem>>, vector<1x16x128xbf16>
    %122 = vector.shape_cast %121 : vector<1x16x128xbf16> to vector<16x128xbf16>
    %123 = vector.shape_cast %120 : vector<16x128xbf16> to vector<1x16x128xbf16>
    tpu.vector_store %arg18[%c0_43, %c0_44, %c0_45], %123 {strides = array<i32>} : memref<12x16x128xbf16, #tpu.memory_space<vmem>>, vector<1x16x128xbf16>,
    %124 = vector.extract_strided_slice %110 {offsets = [0, 1], sizes = [16, 1], strides = [1, 1]} : vector<16x12xi32> to vector<16x1xi32>
    %125 = vector.broadcast %124 : vector<16x1xi32> to vector<16x128xi32>
    %126 = arith.cmpi eq, %125, %112 : vector<16x128xi32>
    %127 = arith.extui %126 : vector<16x128xi1> to vector<16x128xi32>
    %128 = arith.sitofp %127 : vector<16x128xi32> to vector<16x128xf32>
    %129 = arith.truncf %128 : vector<16x128xf32> to vector<16x128xbf16>
    %cst_46 = arith.constant dense<0.000000e+00> : vector<16x128xf32>
    %130 = tpu.matmul %129, %111, %cst_46 {dimension_numbers = #tpu.dot_dimension_numbers<[1], [0], [0], [1], [0, 0, 1, 1], [], []>} : vector<16x128xbf16>, vector<128x128xbf16>, vector<16x128xf32> -> vector<16x128xf32>
    %131 = arith.truncf %130 : vector<16x128xf32> to vector<16x128xbf16>
    %c1_47 = arith.constant 1 : index
    %c0_48 = arith.constant 0 : index
    %c0_49 = arith.constant 0 : index
    %132 = vector.load %arg18[%c1_47, %c0_48, %c0_49] : memref<12x16x128xbf16, #tpu.memory_space<vmem>>, vector<1x16x128xbf16>
    %133 = vector.shape_cast %132 : vector<1x16x128xbf16> to vector<16x128xbf16>
    %134 = vector.shape_cast %131 : vector<16x128xbf16> to vector<1x16x128xbf16>
    tpu.vector_store %arg18[%c1_47, %c0_48, %c0_49], %134 {strides = array<i32>} : memref<12x16x128xbf16, #tpu.memory_space<vmem>>, vector<1x16x128xbf16>,
    %135 = vector.extract_strided_slice %110 {offsets = [0, 2], sizes = [16, 1], strides = [1, 1]} : vector<16x12xi32> to vector<16x1xi32>
    %136 = vector.broadcast %135 : vector<16x1xi32> to vector<16x128xi32>
    %137 = arith.cmpi eq, %136, %112 : vector<16x128xi32>
    %138 = arith.extui %137 : vector<16x128xi1> to vector<16x128xi32>
    %139 = arith.sitofp %138 : vector<16x128xi32> to vector<16x128xf32>
    %140 = arith.truncf %139 : vector<16x128xf32> to vector<16x128xbf16>
    %cst_50 = arith.constant dense<0.000000e+00> : vector<16x128xf32>
    %141 = tpu.matmul %140, %111, %cst_50 {dimension_numbers = #tpu.dot_dimension_numbers<[1], [0], [0], [1], [0, 0, 1, 1], [], []>} : vector<16x128xbf16>, vector<128x128xbf16>, vector<16x128xf32> -> vector<16x128xf32>
    %142 = arith.truncf %141 : vector<16x128xf32> to vector<16x128xbf16>
    %c2_51 = arith.constant 2 : index
    %c0_52 = arith.constant 0 : index
    %c0_53 = arith.constant 0 : index
    %143 = vector.load %arg18[%c2_51, %c0_52, %c0_53] : memref<12x16x128xbf16, #tpu.memory_space<vmem>>, vector<1x16x128xbf16>
    %144 = vector.shape_cast %143 : vector<1x16x128xbf16> to vector<16x128xbf16>
    %145 = vector.shape_cast %142 : vector<16x128xbf16> to vector<1x16x128xbf16>
    tpu.vector_store %arg18[%c2_51, %c0_52, %c0_53], %145 {strides = array<i32>} : memref<12x16x128xbf16, #tpu.memory_space<vmem>>, vector<1x16x128xbf16>,
    %146 = vector.extract_strided_slice %110 {offsets = [0, 3], sizes = [16, 1], strides = [1, 1]} : vector<16x12xi32> to vector<16x1xi32>
    %147 = vector.broadcast %146 : vector<16x1xi32> to vector<16x128xi32>
    %148 = arith.cmpi eq, %147, %112 : vector<16x128xi32>
    %149 = arith.extui %148 : vector<16x128xi1> to vector<16x128xi32>
    %150 = arith.sitofp %149 : vector<16x128xi32> to vector<16x128xf32>
    %151 = arith.truncf %150 : vector<16x128xf32> to vector<16x128xbf16>
    %cst_54 = arith.constant dense<0.000000e+00> : vector<16x128xf32>
    %152 = tpu.matmul %151, %111, %cst_54 {dimension_numbers = #tpu.dot_dimension_numbers<[1], [0], [0], [1], [0, 0, 1, 1], [], []>} : vector<16x128xbf16>, vector<128x128xbf16>, vector<16x128xf32> -> vector<16x128xf32>
    %153 = arith.truncf %152 : vector<16x128xf32> to vector<16x128xbf16>
    %c3_55 = arith.constant 3 : index
    %c0_56 = arith.constant 0 : index
    %c0_57 = arith.constant 0 : index
    %154 = vector.load %arg18[%c3_55, %c0_56, %c0_57] : memref<12x16x128xbf16, #tpu.memory_space<vmem>>, vector<1x16x128xbf16>
    %155 = vector.shape_cast %154 : vector<1x16x128xbf16> to vector<16x128xbf16>
    %156 = vector.shape_cast %153 : vector<16x128xbf16> to vector<1x16x128xbf16>
    tpu.vector_store %arg18[%c3_55, %c0_56, %c0_57], %156 {strides = array<i32>} : memref<12x16x128xbf16, #tpu.memory_space<vmem>>, vector<1x16x128xbf16>,
    %157 = vector.extract_strided_slice %110 {offsets = [0, 4], sizes = [16, 1], strides = [1, 1]} : vector<16x12xi32> to vector<16x1xi32>
    %158 = vector.broadcast %157 : vector<16x1xi32> to vector<16x128xi32>
    %159 = arith.cmpi eq, %158, %112 : vector<16x128xi32>
    %160 = arith.extui %159 : vector<16x128xi1> to vector<16x128xi32>
    %161 = arith.sitofp %160 : vector<16x128xi32> to vector<16x128xf32>
    %162 = arith.truncf %161 : vector<16x128xf32> to vector<16x128xbf16>
    %cst_58 = arith.constant dense<0.000000e+00> : vector<16x128xf32>
    %163 = tpu.matmul %162, %111, %cst_58 {dimension_numbers = #tpu.dot_dimension_numbers<[1], [0], [0], [1], [0, 0, 1, 1], [], []>} : vector<16x128xbf16>, vector<128x128xbf16>, vector<16x128xf32> -> vector<16x128xf32>
    %164 = arith.truncf %163 : vector<16x128xf32> to vector<16x128xbf16>
    %c4_59 = arith.constant 4 : index
    %c0_60 = arith.constant 0 : index
    %c0_61 = arith.constant 0 : index
    %165 = vector.load %arg18[%c4_59, %c0_60, %c0_61] : memref<12x16x128xbf16, #tpu.memory_space<vmem>>, vector<1x16x128xbf16>
    %166 = vector.shape_cast %165 : vector<1x16x128xbf16> to vector<16x128xbf16>
    %167 = vector.shape_cast %164 : vector<16x128xbf16> to vector<1x16x128xbf16>
    tpu.vector_store %arg18[%c4_59, %c0_60, %c0_61], %167 {strides = array<i32>} : memref<12x16x128xbf16, #tpu.memory_space<vmem>>, vector<1x16x128xbf16>,
    %168 = vector.extract_strided_slice %110 {offsets = [0, 5], sizes = [16, 1], strides = [1, 1]} : vector<16x12xi32> to vector<16x1xi32>
    %169 = vector.broadcast %168 : vector<16x1xi32> to vector<16x128xi32>
    %170 = arith.cmpi eq, %169, %112 : vector<16x128xi32>
    %171 = arith.extui %170 : vector<16x128xi1> to vector<16x128xi32>
    %172 = arith.sitofp %171 : vector<16x128xi32> to vector<16x128xf32>
    %173 = arith.truncf %172 : vector<16x128xf32> to vector<16x128xbf16>
    %cst_62 = arith.constant dense<0.000000e+00> : vector<16x128xf32>
    %174 = tpu.matmul %173, %111, %cst_62 {dimension_numbers = #tpu.dot_dimension_numbers<[1], [0], [0], [1], [0, 0, 1, 1], [], []>} : vector<16x128xbf16>, vector<128x128xbf16>, vector<16x128xf32> -> vector<16x128xf32>
    %175 = arith.truncf %174 : vector<16x128xf32> to vector<16x128xbf16>
    %c5_63 = arith.constant 5 : index
    %c0_64 = arith.constant 0 : index
    %c0_65 = arith.constant 0 : index
    %176 = vector.load %arg18[%c5_63, %c0_64, %c0_65] : memref<12x16x128xbf16, #tpu.memory_space<vmem>>, vector<1x16x128xbf16>
    %177 = vector.shape_cast %176 : vector<1x16x128xbf16> to vector<16x128xbf16>
    %178 = vector.shape_cast %175 : vector<16x128xbf16> to vector<1x16x128xbf16>
    tpu.vector_store %arg18[%c5_63, %c0_64, %c0_65], %178 {strides = array<i32>} : memref<12x16x128xbf16, #tpu.memory_space<vmem>>, vector<1x16x128xbf16>,
    %179 = vector.extract_strided_slice %110 {offsets = [0, 6], sizes = [16, 1], strides = [1, 1]} : vector<16x12xi32> to vector<16x1xi32>
    %180 = vector.broadcast %179 : vector<16x1xi32> to vector<16x128xi32>
    %181 = arith.cmpi eq, %180, %112 : vector<16x128xi32>
    %182 = arith.extui %181 : vector<16x128xi1> to vector<16x128xi32>
    %183 = arith.sitofp %182 : vector<16x128xi32> to vector<16x128xf32>
    %184 = arith.truncf %183 : vector<16x128xf32> to vector<16x128xbf16>
    %cst_66 = arith.constant dense<0.000000e+00> : vector<16x128xf32>
    %185 = tpu.matmul %184, %111, %cst_66 {dimension_numbers = #tpu.dot_dimension_numbers<[1], [0], [0], [1], [0, 0, 1, 1], [], []>} : vector<16x128xbf16>, vector<128x128xbf16>, vector<16x128xf32> -> vector<16x128xf32>
    %186 = arith.truncf %185 : vector<16x128xf32> to vector<16x128xbf16>
    %c6_67 = arith.constant 6 : index
    %c0_68 = arith.constant 0 : index
    %c0_69 = arith.constant 0 : index
    %187 = vector.load %arg18[%c6_67, %c0_68, %c0_69] : memref<12x16x128xbf16, #tpu.memory_space<vmem>>, vector<1x16x128xbf16>
    %188 = vector.shape_cast %187 : vector<1x16x128xbf16> to vector<16x128xbf16>
    %189 = vector.shape_cast %186 : vector<16x128xbf16> to vector<1x16x128xbf16>
    tpu.vector_store %arg18[%c6_67, %c0_68, %c0_69], %189 {strides = array<i32>} : memref<12x16x128xbf16, #tpu.memory_space<vmem>>, vector<1x16x128xbf16>,
    %190 = vector.extract_strided_slice %110 {offsets = [0, 7], sizes = [16, 1], strides = [1, 1]} : vector<16x12xi32> to vector<16x1xi32>
    %191 = vector.broadcast %190 : vector<16x1xi32> to vector<16x128xi32>
    %192 = arith.cmpi eq, %191, %112 : vector<16x128xi32>
    %193 = arith.extui %192 : vector<16x128xi1> to vector<16x128xi32>
    %194 = arith.sitofp %193 : vector<16x128xi32> to vector<16x128xf32>
    %195 = arith.truncf %194 : vector<16x128xf32> to vector<16x128xbf16>
    %cst_70 = arith.constant dense<0.000000e+00> : vector<16x128xf32>
    %196 = tpu.matmul %195, %111, %cst_70 {dimension_numbers = #tpu.dot_dimension_numbers<[1], [0], [0], [1], [0, 0, 1, 1], [], []>} : vector<16x128xbf16>, vector<128x128xbf16>, vector<16x128xf32> -> vector<16x128xf32>
    %197 = arith.truncf %196 : vector<16x128xf32> to vector<16x128xbf16>
    %c7_71 = arith.constant 7 : index
    %c0_72 = arith.constant 0 : index
    %c0_73 = arith.constant 0 : index
    %198 = vector.load %arg18[%c7_71, %c0_72, %c0_73] : memref<12x16x128xbf16, #tpu.memory_space<vmem>>, vector<1x16x128xbf16>
    %199 = vector.shape_cast %198 : vector<1x16x128xbf16> to vector<16x128xbf16>
    %200 = vector.shape_cast %197 : vector<16x128xbf16> to vector<1x16x128xbf16>
    tpu.vector_store %arg18[%c7_71, %c0_72, %c0_73], %200 {strides = array<i32>} : memref<12x16x128xbf16, #tpu.memory_space<vmem>>, vector<1x16x128xbf16>,
    %201 = vector.extract_strided_slice %110 {offsets = [0, 8], sizes = [16, 1], strides = [1, 1]} : vector<16x12xi32> to vector<16x1xi32>
    %202 = vector.broadcast %201 : vector<16x1xi32> to vector<16x128xi32>
    %203 = arith.cmpi eq, %202, %112 : vector<16x128xi32>
    %204 = arith.extui %203 : vector<16x128xi1> to vector<16x128xi32>
    %205 = arith.sitofp %204 : vector<16x128xi32> to vector<16x128xf32>
    %206 = arith.truncf %205 : vector<16x128xf32> to vector<16x128xbf16>
    %cst_74 = arith.constant dense<0.000000e+00> : vector<16x128xf32>
    %207 = tpu.matmul %206, %111, %cst_74 {dimension_numbers = #tpu.dot_dimension_numbers<[1], [0], [0], [1], [0, 0, 1, 1], [], []>} : vector<16x128xbf16>, vector<128x128xbf16>, vector<16x128xf32> -> vector<16x128xf32>
    %208 = arith.truncf %207 : vector<16x128xf32> to vector<16x128xbf16>
    %c8 = arith.constant 8 : index
    %c0_75 = arith.constant 0 : index
    %c0_76 = arith.constant 0 : index
    %209 = vector.load %arg18[%c8, %c0_75, %c0_76] : memref<12x16x128xbf16, #tpu.memory_space<vmem>>, vector<1x16x128xbf16>
    %210 = vector.shape_cast %209 : vector<1x16x128xbf16> to vector<16x128xbf16>
    %211 = vector.shape_cast %208 : vector<16x128xbf16> to vector<1x16x128xbf16>
    tpu.vector_store %arg18[%c8, %c0_75, %c0_76], %211 {strides = array<i32>} : memref<12x16x128xbf16, #tpu.memory_space<vmem>>, vector<1x16x128xbf16>,
    %212 = vector.extract_strided_slice %110 {offsets = [0, 9], sizes = [16, 1], strides = [1, 1]} : vector<16x12xi32> to vector<16x1xi32>
    %213 = vector.broadcast %212 : vector<16x1xi32> to vector<16x128xi32>
    %214 = arith.cmpi eq, %213, %112 : vector<16x128xi32>
    %215 = arith.extui %214 : vector<16x128xi1> to vector<16x128xi32>
    %216 = arith.sitofp %215 : vector<16x128xi32> to vector<16x128xf32>
    %217 = arith.truncf %216 : vector<16x128xf32> to vector<16x128xbf16>
    %cst_77 = arith.constant dense<0.000000e+00> : vector<16x128xf32>
    %218 = tpu.matmul %217, %111, %cst_77 {dimension_numbers = #tpu.dot_dimension_numbers<[1], [0], [0], [1], [0, 0, 1, 1], [], []>} : vector<16x128xbf16>, vector<128x128xbf16>, vector<16x128xf32> -> vector<16x128xf32>
    %219 = arith.truncf %218 : vector<16x128xf32> to vector<16x128xbf16>
    %c9 = arith.constant 9 : index
    %c0_78 = arith.constant 0 : index
    %c0_79 = arith.constant 0 : index
    %220 = vector.load %arg18[%c9, %c0_78, %c0_79] : memref<12x16x128xbf16, #tpu.memory_space<vmem>>, vector<1x16x128xbf16>
    %221 = vector.shape_cast %220 : vector<1x16x128xbf16> to vector<16x128xbf16>
    %222 = vector.shape_cast %219 : vector<16x128xbf16> to vector<1x16x128xbf16>
    tpu.vector_store %arg18[%c9, %c0_78, %c0_79], %222 {strides = array<i32>} : memref<12x16x128xbf16, #tpu.memory_space<vmem>>, vector<1x16x128xbf16>,
    %223 = vector.extract_strided_slice %110 {offsets = [0, 10], sizes = [16, 1], strides = [1, 1]} : vector<16x12xi32> to vector<16x1xi32>
    %224 = vector.broadcast %223 : vector<16x1xi32> to vector<16x128xi32>
    %225 = arith.cmpi eq, %224, %112 : vector<16x128xi32>
    %226 = arith.extui %225 : vector<16x128xi1> to vector<16x128xi32>
    %227 = arith.sitofp %226 : vector<16x128xi32> to vector<16x128xf32>
    %228 = arith.truncf %227 : vector<16x128xf32> to vector<16x128xbf16>
    %cst_80 = arith.constant dense<0.000000e+00> : vector<16x128xf32>
    %229 = tpu.matmul %228, %111, %cst_80 {dimension_numbers = #tpu.dot_dimension_numbers<[1], [0], [0], [1], [0, 0, 1, 1], [], []>} : vector<16x128xbf16>, vector<128x128xbf16>, vector<16x128xf32> -> vector<16x128xf32>
    %230 = arith.truncf %229 : vector<16x128xf32> to vector<16x128xbf16>
    %c10 = arith.constant 10 : index
    %c0_81 = arith.constant 0 : index
    %c0_82 = arith.constant 0 : index
    %231 = vector.load %arg18[%c10, %c0_81, %c0_82] : memref<12x16x128xbf16, #tpu.memory_space<vmem>>, vector<1x16x128xbf16>
    %232 = vector.shape_cast %231 : vector<1x16x128xbf16> to vector<16x128xbf16>
    %233 = vector.shape_cast %230 : vector<16x128xbf16> to vector<1x16x128xbf16>
    tpu.vector_store %arg18[%c10, %c0_81, %c0_82], %233 {strides = array<i32>} : memref<12x16x128xbf16, #tpu.memory_space<vmem>>, vector<1x16x128xbf16>,
    %234 = vector.extract_strided_slice %110 {offsets = [0, 11], sizes = [16, 1], strides = [1, 1]} : vector<16x12xi32> to vector<16x1xi32>
    %235 = vector.broadcast %234 : vector<16x1xi32> to vector<16x128xi32>
    %236 = arith.cmpi eq, %235, %112 : vector<16x128xi32>
    %237 = arith.extui %236 : vector<16x128xi1> to vector<16x128xi32>
    %238 = arith.sitofp %237 : vector<16x128xi32> to vector<16x128xf32>
    %239 = arith.truncf %238 : vector<16x128xf32> to vector<16x128xbf16>
    %cst_83 = arith.constant dense<0.000000e+00> : vector<16x128xf32>
    %240 = tpu.matmul %239, %111, %cst_83 {dimension_numbers = #tpu.dot_dimension_numbers<[1], [0], [0], [1], [0, 0, 1, 1], [], []>} : vector<16x128xbf16>, vector<128x128xbf16>, vector<16x128xf32> -> vector<16x128xf32>
    %241 = arith.truncf %240 : vector<16x128xf32> to vector<16x128xbf16>
    %c11 = arith.constant 11 : index
    %c0_84 = arith.constant 0 : index
    %c0_85 = arith.constant 0 : index
    %242 = vector.load %arg18[%c11, %c0_84, %c0_85] : memref<12x16x128xbf16, #tpu.memory_space<vmem>>, vector<1x16x128xbf16>
    %243 = vector.shape_cast %242 : vector<1x16x128xbf16> to vector<16x128xbf16>
    %244 = vector.shape_cast %241 : vector<16x128xbf16> to vector<1x16x128xbf16>
    tpu.vector_store %arg18[%c11, %c0_84, %c0_85], %244 {strides = array<i32>} : memref<12x16x128xbf16, #tpu.memory_space<vmem>>, vector<1x16x128xbf16>,
    %c0_86 = arith.constant 0 : index
    %c0_87 = arith.constant 0 : index
    %c0_88 = arith.constant 0 : index
    %245 = vector.load %arg18[%c0_86, %c0_87, %c0_88] : memref<12x16x128xbf16, #tpu.memory_space<vmem>>, vector<12x16x128xbf16>
    %246 = vector.shape_cast %245 : vector<12x16x128xbf16> to vector<192x128xbf16>
    %c0_89 = arith.constant 0 : index
    %c0_90 = arith.constant 0 : index
    %247 = vector.load %arg8[%c0_89, %c0_90] : memref<128x384xbf16, #tpu.memory_space<vmem>>, vector<128x384xbf16>
    %cst_91 = arith.constant dense<0.000000e+00> : vector<192x384xf32>
    %248 = tpu.matmul %246, %247, %cst_91 {dimension_numbers = #tpu.dot_dimension_numbers<[1], [0], [0], [1], [0, 0, 1, 1], [], []>} : vector<192x128xbf16>, vector<128x384xbf16>, vector<192x384xf32> -> vector<192x384xf32>
    %249 = vector.shape_cast %248 : vector<192x384xf32> to vector<12x16x384xf32>
    %c0_92 = arith.constant 0 : index
    %c0_93 = arith.constant 0 : index
    %250 = vector.load %arg9[%c0_92, %c0_93] : memref<1x128xf32, #tpu.memory_space<vmem>>, vector<1x128xf32>
    %251 = vector.extract_strided_slice %249 {offsets = [0, 0, 0], sizes = [10, 16, 128], strides = [1, 1, 1]} : vector<12x16x384xf32> to vector<10x16x128xf32>
    %252 = vector.shape_cast %250 : vector<1x128xf32> to vector<1x1x128xf32>
    %253 = vector.broadcast %252 : vector<1x1x128xf32> to vector<10x16x128xf32>
    %254 = arith.addf %253, %251 : vector<10x16x128xf32>
    %255 = vector.extract_strided_slice %249 {offsets = [1, 0, 128], sizes = [10, 16, 128], strides = [1, 1, 1]} : vector<12x16x384xf32> to vector<10x16x128xf32>
    %256 = arith.addf %254, %255 : vector<10x16x128xf32>
    %257 = vector.extract_strided_slice %249 {offsets = [2, 0, 256], sizes = [10, 16, 128], strides = [1, 1, 1]} : vector<12x16x384xf32> to vector<10x16x128xf32>
    %258 = arith.addf %256, %257 : vector<10x16x128xf32>
    %cst_94 = arith.constant 0.000000e+00 : f32
    %259 = vector.broadcast %cst_94 : f32 to vector<10x16x128xf32>
    %260 = arith.maximumf %258, %259 : vector<10x16x128xf32>
    %cst_95 = arith.constant dense<0.000000e+00> : vector<16x128xf32>
    %261 = vector.multi_reduction <add>, %260, %cst_95 [0] : vector<10x16x128xf32> to vector<16x128xf32>
    %cst_96 = arith.constant 1.000000e-01 : f32
    %262 = vector.broadcast %cst_96 : f32 to vector<16x128xf32>
    %263 = arith.mulf %261, %262 : vector<16x128xf32>
    %c0_97 = arith.constant 0 : index
    %c0_98 = arith.constant 0 : index
    %264 = vector.load %arg3[%c0_97, %c0_98] : memref<16x128xbf16, #tpu.memory_space<vmem>>, vector<16x128xbf16>
    %c0_99 = arith.constant 0 : index
    %c0_100 = arith.constant 0 : index
    %265 = vector.load %arg10[%c0_99, %c0_100] : memref<128x128xbf16, #tpu.memory_space<vmem>>, vector<128x128xbf16>
    %cst_101 = arith.constant dense<0.000000e+00> : vector<16x128xf32>
    %266 = tpu.matmul %264, %265, %cst_101 {dimension_numbers = #tpu.dot_dimension_numbers<[1], [0], [0], [1], [0, 0, 1, 1], [], []>} : vector<16x128xbf16>, vector<128x128xbf16>, vector<16x128xf32> -> vector<16x128xf32>
    %c0_102 = arith.constant 0 : index
    %c0_103 = arith.constant 0 : index
    %267 = vector.load %arg11[%c0_102, %c0_103] : memref<1x128xf32, #tpu.memory_space<vmem>>, vector<1x128xf32>
    %268 = vector.broadcast %267 : vector<1x128xf32> to vector<16x128xf32>
    %269 = arith.addf %266, %268 : vector<16x128xf32>
    %cst_104 = arith.constant 0.000000e+00 : f32
    %270 = vector.broadcast %cst_104 : f32 to vector<16x128xf32>
    %271 = arith.maximumf %269, %270 : vector<16x128xf32>
    %c0_105 = arith.constant 0 : index
    %c0_106 = arith.constant 0 : index
    %272 = vector.load %arg12[%c0_105, %c0_106] : memref<1x128xf32, #tpu.memory_space<vmem>>, vector<1x128xf32>
    %273 = vector.broadcast %272 : vector<1x128xf32> to vector<16x128xf32>
    %274 = arith.mulf %109, %273 : vector<16x128xf32>
    %cst_107 = arith.constant dense<0.000000e+00> : vector<16xf32>
    %275 = vector.multi_reduction <add>, %274, %cst_107 [1] : vector<16x128xf32> to vector<16xf32>
    %276 = vector.shape_cast %275 : vector<16xf32> to vector<16x1xf32>
    %c0_108 = arith.constant 0 : index
    %c0_109 = arith.constant 0 : index
    %277 = vector.load %arg13[%c0_108, %c0_109] : memref<1x128xf32, #tpu.memory_space<vmem>>, vector<1x128xf32>
    %278 = vector.broadcast %277 : vector<1x128xf32> to vector<16x128xf32>
    %279 = arith.mulf %263, %278 : vector<16x128xf32>
    %cst_110 = arith.constant dense<0.000000e+00> : vector<16xf32>
    %280 = vector.multi_reduction <add>, %279, %cst_110 [1] : vector<16x128xf32> to vector<16xf32>
    %281 = vector.shape_cast %280 : vector<16xf32> to vector<16x1xf32>
    %282 = arith.addf %276, %281 : vector<16x1xf32>
    %c0_111 = arith.constant 0 : index
    %c0_112 = arith.constant 0 : index
    %283 = vector.load %arg14[%c0_111, %c0_112] : memref<1x128xf32, #tpu.memory_space<vmem>>, vector<1x128xf32>
    %284 = vector.broadcast %283 : vector<1x128xf32> to vector<16x128xf32>
    %285 = arith.mulf %271, %284 : vector<16x128xf32>
    %cst_113 = arith.constant dense<0.000000e+00> : vector<16xf32>
    %286 = vector.multi_reduction <add>, %285, %cst_113 [1] : vector<16x128xf32> to vector<16xf32>
    %287 = vector.shape_cast %286 : vector<16xf32> to vector<16x1xf32>
    %288 = arith.addf %282, %287 : vector<16x1xf32>
    %c0_114 = arith.constant 0 : index
    %c0_115 = arith.constant 0 : index
    %289 = vector.load %arg15[%c0_114, %c0_115] : memref<1x1xf32, #tpu.memory_space<vmem>>, vector<1x1xf32>
    %290 = vector.broadcast %289 : vector<1x1xf32> to vector<16x1xf32>
    %291 = arith.addf %288, %290 : vector<16x1xf32>
    %c0_116 = arith.constant 0 : index
    %c0_117 = arith.constant 0 : index
    %292 = vector.load %arg16[%c0_116, %c0_117] : memref<16x1xf32, #tpu.memory_space<vmem>>, vector<16x1xf32>
    tpu.vector_store %arg16[%c0_116, %c0_117], %291 {strides = array<i32>} : memref<16x1xf32, #tpu.memory_space<vmem>>, vector<16x1xf32>,
    return
  }
  func.func @transform_0(%arg0: i32) -> (i32, i32) {
    %c0_i32 = arith.constant 0 : i32
    %c0_i32_0 = arith.constant 0 : i32
    return %arg0, %c0_i32 : i32, i32
  }
  func.func @transform_1(%arg0: i32) -> (i32, i32) {
    %c0_i32 = arith.constant 0 : i32
    %c0_i32_0 = arith.constant 0 : i32
    return %arg0, %c0_i32 : i32, i32
  }
  func.func @transform_2(%arg0: i32) -> (i32, i32) {
    %c0_i32 = arith.constant 0 : i32
    %c0_i32_0 = arith.constant 0 : i32
    return %arg0, %c0_i32 : i32, i32
  }
  func.func @transform_3(%arg0: i32) -> (i32, i32) {
    %c0_i32 = arith.constant 0 : i32
    %c0_i32_0 = arith.constant 0 : i32
    %c0_i32_1 = arith.constant 0 : i32
    return %c0_i32, %c0_i32_0 : i32, i32
  }
  func.func @transform_4(%arg0: i32) -> (i32, i32) {
    %c0_i32 = arith.constant 0 : i32
    %c0_i32_0 = arith.constant 0 : i32
    %c0_i32_1 = arith.constant 0 : i32
    return %c0_i32, %c0_i32_0 : i32, i32
  }
  func.func @transform_5(%arg0: i32) -> (i32, i32) {
    %c0_i32 = arith.constant 0 : i32
    %c0_i32_0 = arith.constant 0 : i32
    %c0_i32_1 = arith.constant 0 : i32
    return %c0_i32, %c0_i32_0 : i32, i32
  }
  func.func @transform_6(%arg0: i32) -> (i32, i32) {
    %c0_i32 = arith.constant 0 : i32
    %c0_i32_0 = arith.constant 0 : i32
    %c0_i32_1 = arith.constant 0 : i32
    return %c0_i32, %c0_i32_0 : i32, i32
  }
  func.func @transform_7(%arg0: i32) -> (i32, i32) {
    %c0_i32 = arith.constant 0 : i32
    %c0_i32_0 = arith.constant 0 : i32
    %c0_i32_1 = arith.constant 0 : i32
    return %c0_i32, %c0_i32_0 : i32, i32
  }
  func.func @transform_8(%arg0: i32) -> (i32, i32) {
    %c0_i32 = arith.constant 0 : i32
    %c0_i32_0 = arith.constant 0 : i32
    %c0_i32_1 = arith.constant 0 : i32
    return %c0_i32, %c0_i32_0 : i32, i32
  }
  func.func @transform_9(%arg0: i32) -> (i32, i32) {
    %c0_i32 = arith.constant 0 : i32
    %c0_i32_0 = arith.constant 0 : i32
    %c0_i32_1 = arith.constant 0 : i32
    return %c0_i32, %c0_i32_0 : i32, i32
  }
  func.func @transform_10(%arg0: i32) -> (i32, i32) {
    %c0_i32 = arith.constant 0 : i32
    %c0_i32_0 = arith.constant 0 : i32
    %c0_i32_1 = arith.constant 0 : i32
    return %c0_i32, %c0_i32_0 : i32, i32
  }
  func.func @transform_11(%arg0: i32) -> (i32, i32) {
    %c0_i32 = arith.constant 0 : i32
    %c0_i32_0 = arith.constant 0 : i32
    %c0_i32_1 = arith.constant 0 : i32
    return %c0_i32, %c0_i32_0 : i32, i32
  }
  func.func @transform_12(%arg0: i32) -> (i32, i32) {
    %c0_i32 = arith.constant 0 : i32
    %c0_i32_0 = arith.constant 0 : i32
    %c0_i32_1 = arith.constant 0 : i32
    return %c0_i32, %c0_i32_0 : i32, i32
  }
  func.func @transform_13(%arg0: i32) -> (i32, i32) {
    %c0_i32 = arith.constant 0 : i32
    %c0_i32_0 = arith.constant 0 : i32
    %c0_i32_1 = arith.constant 0 : i32
    return %c0_i32, %c0_i32_0 : i32, i32
  }
  func.func @transform_14(%arg0: i32) -> (i32, i32) {
    %c0_i32 = arith.constant 0 : i32
    %c0_i32_0 = arith.constant 0 : i32
    %c0_i32_1 = arith.constant 0 : i32
    return %c0_i32, %c0_i32_0 : i32, i32
  }
  func.func @transform_15(%arg0: i32) -> (i32, i32) {
    %c0_i32 = arith.constant 0 : i32
    %c0_i32_0 = arith.constant 0 : i32
    return %arg0, %c0_i32 : i32, i32
  }
}

</mosaic_0001>

<bundles_post_ra>
// kernel: three_inputs_net.1
= control target key start
LH: loop header
LB: loop body
LE: loop exit
PB: predicated region body
PF: predicated region fallthrough
CT: control target
= control target key end

     0   :  { %v3502_v0 = vmov 1   ;;  %v3503_v1 = vmov 0   ;;  %v3504_v5 = vmov 0.0   ;;  %v3505_v8 = vmov 2   ;;  %s4458_s0 = inlined_call_operand.vmem [shape: s32[16,8], index: 0, kind: input, shape index: {}]   ;;  %s4459_s3 = inlined_call_operand.vmem [shape: bf16[128,128], index: 3, kind: input, shape index: {}]   ;;  %s4460_s4 = inlined_call_operand.vmem [shape: bf16[128,384], index: 4, kind: input, shape index: {}]   ;;  %s4461_s1 = inlined_call_operand.vmem [shape: s32[16,12], index: 1, kind: input, shape index: {}]   ;;  %s4462_s6 = inlined_call_operand.vmem [shape: bf16[128,128], index: 6, kind: input, shape index: {}]   ;;  %s4463_s7 = inlined_call_operand.vmem [shape: bf16[128,384], index: 7, kind: input, shape index: {}]   ;;  %s4464_s5 = inlined_call_operand.vmem [shape: f32[1,128], index: 5, kind: input, shape index: {}]   ;;  %s4465_s11 = inlined_call_operand.vmem [shape: f32[1,128], index: 11, kind: input, shape index: {}]   ;;  %s4466_s9 = inlined_call_operand.vmem [shape: bf16[128,128], index: 9, kind: input, shape index: {}]   ;;  %s4467_s2 = inlined_call_operand.vmem [shape: bf16[16,128], index: 2, kind: input, shape index: {}]   ;;  %s4468_s8 = inlined_call_operand.vmem [shape: f32[1,128], index: 8, kind: input, shape index: {}]   ;;  %s4469_s10 = inlined_call_operand.vmem [shape: f32[1,128], index: 10, kind: input, shape index: {}]   ;;  %s4470_s12 = inlined_call_operand.vmem [shape: f32[1,128], index: 12, kind: input, shape index: {}]   ;;  %s4471_s13 = inlined_call_operand.vmem [shape: f32[1,128], index: 13, kind: input, shape index: {}]   ;;  %s4472_s14 = inlined_call_operand.<no memory space> [shape: f32[1,1], index: 14, kind: input, shape index: {}]   ;;  %s4473_s15 = inlined_call_operand.vmem [shape: f32[16,1], index: 15, kind: output, shape index: {}]  }
   0x1   :  { %3381 = vset.pattern.permute.xlu1 %v3502_v0  ;;  %3380 = vset.pattern.permute.xlu0 %v3503_v1  ;;  %v3602_v2 = vld [vmem:[%s4458_s0] sm:$0xff]  ;;  %v3614_v4 = vld [vmem:[%s4458_s0 + $0x8] sm:$0xff]  ;;  %v3634_v7 = vld [vmem:[%s4459_s3 + $0x10] sm:$0xff]   ;;  %vm3506_vm0 = vmmov 0   ;;  %v3507_v10 = vmov 3   ;;  %v3508_v12 = vmov 4   ;;  %v71_v21 = vlaneseq }
   0x2   :  { %178 = vperm.xlu1 %3381, %v3602_v2   ;;  %74 = vperm.xlu0 %3380, %v3602_v2   ;;  %v3609_v3 = vld [vmem:[%s4459_s3] sm:$0xff]   ;;  %v3623_v6 = vld [vmem:[%s4459_s3 + $0x8] sm:$0xff]   ;;  %v3649_v9 = vld [vmem:[%s4459_s3 + $0x18] sm:$0xff]   ;;  %v3509_v13 = vmov 5   ;;  %v3510_v15 = vmov 6   ;;  %v3511_v18 = vmov 7  }
   0x3   :  { %2873 = vmatprep.subr.bf16.mxu0 %v3504_v5  ;;  %2893 = vmatprep.subr.bf16.mxu1 %v3504_v5  ;;  %v3666_v11 = vld [vmem:[%s4459_s3 + $0x20] sm:$0xff]   ;;  %v3677_v14 = vld [vmem:[%s4459_s3 + $0x28] sm:$0xff]   ;;  %v3688_v16 = vld [vmem:[%s4459_s3 + $0x30] sm:$0xff]   ;;  %v3738_v24 = vand.u32 127, %v71_v21  ;;  %v3512_v27 = vmov 1.0|1.0  }
   0x4   :  { %2874 = vmatpush3.bf16.msra.mxu0 %v3609_v3  ;;  %2894 = vmatpush3.bf16.msra.mxu1 %v3609_v3  ;;  %v3699_v17 = vld [vmem:[%s4459_s3 + $0x38] sm:$0xff]   ;;  %v3718_v19 = vld [vmem:[%s4461_s1 + $0x8] sm:$0xff]  ;;  %v3723_v20 = vld [vmem:[%s4461_s1] sm:$0xff] }
   0x5   :  { %2875 = vmatprep.subr.bf16.mxu0 %v3504_v5  ;;  %2895 = vmatprep.subr.bf16.mxu1 %v3504_v5  ;;  %v3424_v40 = vld [vmem:[%s4460_s4 + $0x8] ss:$12 sps:$4 sm:$0xff]   ;;  %v3423_v41 = vld [vmem:[%s4460_s4 + $0x4] ss:$12 sps:$4 sm:$0xff]   ;;  %v3421_v42 = vld [vmem:[%s4460_s4] ss:$12 sps:$4 sm:$0xff]  }
   0x6   :  { %181 = vperm.xlu1 %3381, %v3614_v4   ;;  %77 = vperm.xlu0 %3380, %v3614_v4   ;;  %v3428_v43 = vld [vmem:[%s4460_s4 + $0x20] ss:$12 sps:$4 sm:$0xff]   ;;  %v3427_v44 = vld [vmem:[%s4460_s4 + $0x1c] ss:$12 sps:$4 sm:$0xff]   ;;  %v3425_v45 = vld [vmem:[%s4460_s4 + $0x18] ss:$12 sps:$4 sm:$0xff]  }
   0x7   :  { %2889 = vmatprep.mubr.msk.bf16.mxu0 %vm3506_vm0, %v3504_v5  ;;  %2909 = vmatprep.mubr.msk.bf16.mxu1 %vm3506_vm0, %v3504_v5  ;;  %v3432_v46 = vld [vmem:[%s4460_s4 + $0x38] ss:$12 sps:$4 sm:$0xff]   ;;  %v3431_v47 = vld [vmem:[%s4460_s4 + $0x34] ss:$12 sps:$4 sm:$0xff]   ;;  %v3429_v48 = vld [vmem:[%s4460_s4 + $0x30] ss:$12 sps:$4 sm:$0xff]  }
   0x8   :  { %2876 = vmatpush3.bf16.msra.mxu0 %v3623_v6  ;;  %2896 = vmatpush3.bf16.msra.mxu1 %v3623_v6  ;;  %v3436_v49 = vld [vmem:[%s4460_s4 + $0x50] ss:$12 sps:$4 sm:$0xff]   ;;  %v3435_v50 = vld [vmem:[%s4460_s4 + $0x4c] ss:$12 sps:$4 sm:$0xff]   ;;  %v3433_v51 = vld [vmem:[%s4460_s4 + $0x48] ss:$12 sps:$4 sm:$0xff]  }
   0x9   :  { %2877 = vmatprep.subr.bf16.mxu0 %v3504_v5  ;;  %2897 = vmatprep.subr.bf16.mxu1 %v3504_v5  ;;  %v3440_v52 = vld [vmem:[%s4460_s4 + $0x68] ss:$12 sps:$4 sm:$0xff]   ;;  %v3439_v53 = vld [vmem:[%s4460_s4 + $0x64] ss:$12 sps:$4 sm:$0xff]   ;;  %v3437_v54 = vld [vmem:[%s4460_s4 + $0x60] ss:$12 sps:$4 sm:$0xff]  }
   0xa   :  { %3383 = vset.pattern.permute.xlu1 %v3505_v8  ;;  %3382 = vset.pattern.permute.xlu0 %v3505_v8  ;;  %v3444_v55 = vld [vmem:[%s4460_s4 + $0x80] ss:$12 sps:$4 sm:$0xff]   ;;  %v3443_v56 = vld [vmem:[%s4460_s4 + $0x7c] ss:$12 sps:$4 sm:$0xff]   ;;  %v3441_v57 = vld [vmem:[%s4460_s4 + $0x78] ss:$12 sps:$4 sm:$0xff]  }
   0xb   :  { %238 = vperm.xlu1 %3383, %v3614_v4   ;;  %235 = vperm.xlu0 %3382, %v3602_v2   ;;  %v3448_v58 = vld [vmem:[%s4460_s4 + $0x98] ss:$12 sps:$4 sm:$0xff]   ;;  %v3447_v59 = vld [vmem:[%s4460_s4 + $0x94] ss:$12 sps:$4 sm:$0xff]   ;;  %v3445_v60 = vld [vmem:[%s4460_s4 + $0x90] ss:$12 sps:$4 sm:$0xff]  }
   0xc   :  { %2878 = vmatpush3.bf16.msra.mxu0 %v3634_v7  ;;  %2898 = vmatpush3.bf16.msra.mxu1 %v3634_v7  ;;  %v3452_v61 = vld [vmem:[%s4460_s4 + $0xb0] ss:$12 sps:$4 sm:$0xff]   ;;  %v3451_v62 = vld [vmem:[%s4460_s4 + $0xac] ss:$12 sps:$4 sm:$0xff]   ;;  %v3449_v63 = vld [vmem:[%s4460_s4 + $0xa8] ss:$12 sps:$4 sm:$0xff]  }
   0xd   :  { %2879 = vmatprep.subr.bf16.mxu0 %v3504_v5  ;;  %2899 = vmatprep.subr.bf16.mxu1 %v3504_v5  ;;  %v3996_v21 = vld [vmem:[%s4462_s6 + $0x18] sm:$0xff]  }
   0xf   :  { %3384 = vset.pattern.permute.xlu1 %v3507_v10  ;;  %3385 = vset.pattern.permute.xlu0 %v3507_v10 }
  0x10   :  { %292 = vperm.xlu1 %3384, %v3602_v2   ;;  %295 = vperm.xlu0 %3385, %v3614_v4  }
  0x11   :  { %2880 = vmatpush3.bf16.msra.mxu0 %v3649_v9  ;;  %2900 = vmatpush3.bf16.msra.mxu1 %v3649_v9 }
  0x12   :  { %2881 = vmatprep.subr.bf16.mxu0 %v3504_v5  ;;  %2901 = vmatprep.subr.bf16.mxu1 %v3504_v5 }
  0x14   :  { %3386 = vset.pattern.permute.xlu1 %v3508_v12  ;;  %3387 = vset.pattern.permute.xlu0 %v3509_v13 }
  0x15   :  { %349 = vperm.xlu1 %3386, %v3602_v2   ;;  %406 = vperm.xlu0 %3387, %v3602_v2  }
  0x16   :  { %2882 = vmatpush3.bf16.msra.mxu0 %v3666_v11  ;;  %2902 = vmatpush3.bf16.msra.mxu1 %v3666_v11 }
  0x17   :  { %2883 = vmatprep.subr.bf16.mxu0 %v3504_v5  ;;  %2903 = vmatprep.subr.bf16.mxu1 %v3504_v5 }
  0x19   :  { %352 = vperm.xlu1 %3386, %v3614_v4   ;;  %3390 = vset.pattern.permute.xlu0 %v3510_v15 }
  0x1a   :  { %466 = vperm.xlu0 %3390, %v3614_v4   ;;  %2884 = vmatpush3.bf16.msra.mxu0 %v3677_v14 }
  0x1b   :  { %2904 = vmatpush3.bf16.msra.mxu1 %v3677_v14  ;;  %2885 = vmatprep.subr.bf16.mxu0 %v3504_v5 }
  0x1c   :  { %2905 = vmatprep.subr.bf16.mxu1 %v3504_v5 }
  0x1d   :  { %3388 = vset.pattern.permute.xlu1 %v3509_v13 }
  0x1e   :  { %409 = vperm.xlu1 %3388, %v3614_v4   ;;  %2886 = vmatpush3.bf16.msra.mxu0 %v3688_v16 }
  0x1f   :  { %2906 = vmatpush3.bf16.msra.mxu1 %v3688_v16  ;;  %2887 = vmatprep.subr.bf16.mxu0 %v3504_v5 }
  0x20   :  { %2907 = vmatprep.subr.bf16.mxu1 %v3504_v5  ;;  %3392 = vset.pattern.permute.xlu0 %v3503_v1 }
  0x21   :  { %1028 = vperm.xlu0 %3392, %v3723_v20  }
  0x22   :  { %3389 = vset.pattern.permute.xlu1 %v3510_v15  ;;  %2888 = vmatpush3.bf16.msra.mxu0 %v3699_v17 }
  0x23   :  { %463 = vperm.xlu1 %3389, %v3602_v2   ;;  %2908 = vmatpush3.bf16.msra.mxu1 %v3699_v17 }
  0x24   :  { %2913 = vmatprep.subr.bf16.mxu0 %v3504_v5  ;;  %2933 = vmatprep.subr.bf16.mxu1 %v3504_v5 }
  0x25   :  { %3395 = vset.pattern.permute.xlu0 %v3502_v0 }
  0x26   :  { %1135 = vperm.xlu0 %3395, %v3718_v19  }
  0x27   :  { %3391 = vset.pattern.permute.xlu1 %v3511_v18 }
  0x28   :  { %520 = vperm.xlu1 %3391, %v3602_v2   ;;  %v3514_v2 = vmov 9  }
  0x2a   :  { %3397 = vset.pattern.permute.xlu0 %v3507_v10 }
  0x2b   :  { %1246 = vperm.xlu0 %3397, %v3723_v20  }
  0x2c   :  { %523 = vperm.xlu1 %3391, %v3614_v4  }
  0x2f   :  { %3400 = vset.pattern.permute.xlu0 %v3508_v12 }
  0x30   :  { %3393 = vset.pattern.permute.xlu1 %v3503_v1  ;;  %1306 = vperm.xlu0 %3400, %v3718_v19  }
  0x31   :  { %1031 = vperm.xlu1 %3393, %v3718_v19  }
  0x34   :  { %3402 = vset.pattern.permute.xlu0 %v3510_v15 }
  0x35   :  { %3394 = vset.pattern.permute.xlu1 %v3502_v0  ;;  %1417 = vperm.xlu0 %3402, %v3723_v20   ;;  %v3513_v0 = vmov 8  }
  0x36   :  { %1132 = vperm.xlu1 %3394, %v3723_v20  }
  0x39   :  { %3405 = vset.pattern.permute.xlu0 %v3511_v18 }
  0x3a   :  { %3396 = vset.pattern.permute.xlu1 %v3505_v8  ;;  %1477 = vperm.xlu0 %3405, %v3718_v19  }
  0x3b   :  { %1189 = vperm.xlu1 %3396, %v3723_v20  }
  0x3e   :  { %3407 = vset.pattern.permute.xlu0 %v3514_v2 }
  0x3f   :  { %1192 = vperm.xlu1 %3396, %v3718_v19   ;;  %1588 = vperm.xlu0 %3407, %v3723_v20  }
  0x43   :  { %3398 = vset.pattern.permute.xlu1 %v3507_v10 }
  0x44   :  { %1249 = vperm.xlu1 %3398, %v3718_v19  }
  0x48   :  { %3399 = vset.pattern.permute.xlu1 %v3508_v12 }
  0x49   :  { %1303 = vperm.xlu1 %3399, %v3723_v20  }
  0x4d   :  { %3401 = vset.pattern.permute.xlu1 %v3509_v13 }
  0x4e   :  { %1360 = vperm.xlu1 %3401, %v3723_v20  }
  0x52   :  { %1363 = vperm.xlu1 %3401, %v3718_v19  }
  0x56   :  { %3403 = vset.pattern.permute.xlu1 %v3510_v15  ;;  %v3515_v15 = vmov 10  }
  0x57   :  { %1420 = vperm.xlu1 %3403, %v3718_v19   ;;  %3410 = vset.pattern.permute.xlu0 %v3515_v15 }
  0x58   :  { %1648 = vperm.xlu0 %3410, %v3718_v19  }
  0x5b   :  { %3404 = vset.pattern.permute.xlu1 %v3511_v18  ;;  %v3516_v18 = vmov 11  }
  0x5c   :  { %1474 = vperm.xlu1 %3404, %v3723_v20   ;;  %3412 = vset.pattern.permute.xlu0 %v3516_v18 }
  0x60   :  { %3406 = vset.pattern.permute.xlu1 %v3513_v0 }
  0x61   :  { %1531 = vperm.xlu1 %3406, %v3723_v20  }
  0x65   :  { %1534 = vperm.xlu1 %3406, %v3718_v19  }
  0x69   :  { %3408 = vset.pattern.permute.xlu1 %v3514_v2 }
  0x6a   :  { %1591 = vperm.xlu1 %3408, %v3718_v19  }
  0x6e   :  { %3409 = vset.pattern.permute.xlu1 %v3515_v15 }
  0x6f   :  { %1645 = vperm.xlu1 %3409, %v3723_v20  }
  0x73   :  { %3411 = vset.pattern.permute.xlu1 %v3516_v18 }
  0x74   :  { %1702 = vperm.xlu1 %3411, %v3723_v20   ;;  %v4006_v20 = vld [vmem:[%s4462_s6 + $0x20] sm:$0xff]  }
  0x78   :  { %1705 = vperm.xlu1 %3411, %v3718_v19   ;;  %v4025_v19 = vld [vmem:[%s4462_s6 + $0x30] sm:$0xff]  }
  0x81   :  { %v179_v22 = vpop.permute.xlu1 %178  ;;  %v75_v23 = vpop.permute.xlu0 %74 }
  0x82   :  { %vm183_vm1 = vcmp.eq.s32.totalorder %v179_v22, %v3738_v24  ;;  %vm79_vm4 = vcmp.eq.s32.totalorder %v75_v23, %v3738_v24  ;;  %v4015_v22 = vld [vmem:[%s4462_s6 + $0x28] sm:$0xff]  }
  0x85   :  { %v182_v25 = vpop.permute.xlu1 %181  ;;  %v78_v26 = vpop.permute.xlu0 %77 }
  0x86   :  { %vm184_vm2 = vcmp.eq.s32.totalorder %v182_v25, %v3738_v24  ;;  %vm80_vm3 = vcmp.eq.s32.totalorder %v78_v26, %v3738_v24  ;;  %v4034_v25 = vld [vmem:[%s4462_s6 + $0x38] sm:$0xff]  }
  0x87   :  { %vm2502_vm5 = vmpackc.low %vm184_vm2, %vm183_vm1 }
  0x88   :  { %vm2498_vm6 = vmpackc.low %vm80_vm3, %vm79_vm4  ;;  %2910 = vmatmul.mubr.msk.bf16.vlgmr.msra.gmra.mrb[0].mxu1 %vm2502_vm5, %v3512_v27 }
  0x89   :  { %2890 = vmatmul.mubr.msk.bf16.vlgmr.msra.gmra.mrb[0].mxu0 %vm2498_vm6, %v3512_v27  ;;  %2934 = vmatpush3.bf16.msra.mxu1 %v3609_v3 }
  0x8a   :  { %2914 = vmatpush3.bf16.msra.mxu0 %v3609_v3  ;;  %2935 = vmatprep.subr.bf16.mxu1 %v3504_v5  ;;  %v239_v28 = vpop.permute.xlu1 %238  ;;  %v236_v29 = vpop.permute.xlu0 %235 }
  0x8b   :  { %2915 = vmatprep.subr.bf16.mxu0 %v3504_v5  ;;  %2929 = vmatprep.mubr.msk.bf16.mxu0 %vm3506_vm0, %v3504_v5  ;;  %vm241_vm9 = vcmp.eq.s32.totalorder %v239_v28, %v3738_v24  ;;  %vm240_vm10 = vcmp.eq.s32.totalorder %v236_v29, %v3738_v24 }
  0x8c   :  { %2949 = vmatprep.mubr.msk.bf16.mxu1 %vm3506_vm0, %v3504_v5  ;;  %vm2506_vm12 = vmpackc.low %vm241_vm9, %vm240_vm10 }
  0x8d   :  { %2936 = vmatpush3.bf16.msra.mxu1 %v3623_v6 }
  0x8e   :  { %2916 = vmatpush3.bf16.msra.mxu0 %v3623_v6  ;;  %2937 = vmatprep.subr.bf16.mxu1 %v3504_v5 }
  0x8f   :  { %2917 = vmatprep.subr.bf16.mxu0 %v3504_v5  ;;  %v293_v30 = vpop.permute.xlu1 %292  ;;  %v296_v31 = vpop.permute.xlu0 %295 }
  0x90   :  { %vm297_vm7 = vcmp.eq.s32.totalorder %v293_v30, %v3738_v24  ;;  %vm298_vm8 = vcmp.eq.s32.totalorder %v296_v31, %v3738_v24 }
  0x91   :  { %2938 = vmatpush3.bf16.msra.mxu1 %v3634_v7  ;;  %vm2510_vm11 = vmpackc.low %vm298_vm8, %vm297_vm7 }
  0x92   :  { %2918 = vmatpush3.bf16.msra.mxu0 %v3634_v7  ;;  %2939 = vmatprep.subr.bf16.mxu1 %v3504_v5 }
  0x93   :  { %2919 = vmatprep.subr.bf16.mxu0 %v3504_v5 }
  0x94   :  { %v350_v32 = vpop.permute.xlu1 %349  ;;  %v407_v35 = vpop.permute.xlu0 %406 }
  0x95   :  { %2940 = vmatpush3.bf16.msra.mxu1 %v3649_v9  ;;  %vm411_vm14 = vcmp.eq.s32.totalorder %v407_v35, %v3738_v24  ;;  %vm354_vm15 = vcmp.eq.s32.totalorder %v350_v32, %v3738_v24 }
  0x96   :  { %2920 = vmatpush3.bf16.msra.mxu0 %v3649_v9  ;;  %2941 = vmatprep.subr.bf16.mxu1 %v3504_v5 }
  0x97   :  { %2921 = vmatprep.subr.bf16.mxu0 %v3504_v5 }
  0x98   :  { %v353_v33 = vpop.permute.xlu1 %352 }
  0x99   :  { %2942 = vmatpush3.bf16.msra.mxu1 %v3666_v11  ;;  %vm355_vm1 = vcmp.eq.s32.totalorder %v353_v33, %v3738_v24  ;;  %v467_v39 = vpop.permute.xlu0 %466 }
  0x9a   :  { %2922 = vmatpush3.bf16.msra.mxu0 %v3666_v11  ;;  %2943 = vmatprep.subr.bf16.mxu1 %v3504_v5  ;;  %vm2514_vm3 = vmpackc.low %vm355_vm1, %vm354_vm15  ;;  %vm469_vm7 = vcmp.eq.s32.totalorder %v467_v39, %v3738_v24 }
  0x9b   :  { %2923 = vmatprep.subr.bf16.mxu0 %v3504_v5 }
  0x9d   :  { %2944 = vmatpush3.bf16.msra.mxu1 %v3677_v14  ;;  %v410_v34 = vpop.permute.xlu1 %409 }
  0x9e   :  { %2924 = vmatpush3.bf16.msra.mxu0 %v3677_v14  ;;  %2945 = vmatprep.subr.bf16.mxu1 %v3504_v5  ;;  %vm412_vm13 = vcmp.eq.s32.totalorder %v410_v34, %v3738_v24 }
  0x9f   :  { %2925 = vmatprep.subr.bf16.mxu0 %v3504_v5  ;;  %vm2518_vm2 = vmpackc.low %vm412_vm13, %vm411_vm14 }
  0xa1   :  { %2946 = vmatpush3.bf16.msra.mxu1 %v3688_v16 }
  0xa2   :  { %2926 = vmatpush3.bf16.msra.mxu0 %v3688_v16  ;;  %2947 = vmatprep.subr.bf16.mxu1 %v3504_v5  ;;  %v464_v36 = vpop.permute.xlu1 %463 }
  0xa3   :  { %2927 = vmatprep.subr.bf16.mxu0 %v3504_v5  ;;  %vm468_vm6 = vcmp.eq.s32.totalorder %v464_v36, %v3738_v24 }
  0xa4   :  { %vm2522_vm9 = vmpackc.low %vm469_vm7, %vm468_vm6 }
  0xa5   :  { %2948 = vmatpush3.bf16.msra.mxu1 %v3699_v17 }
  0xa6   :  { %2928 = vmatpush3.bf16.msra.mxu0 %v3699_v17  ;;  %2973 = vmatprep.subr.bf16.mxu1 %v3504_v5 }
  0xa7   :  { %2953 = vmatprep.subr.bf16.mxu0 %v3504_v5  ;;  %v521_v37 = vpop.permute.xlu1 %520 }
  0xa8   :  { %2950 = vmatmul.mubr.msk.bf16.vlgmr.msra.gmra.mrb[4].mxu1 %vm2510_vm11, %v3512_v27  ;;  %vm525_vm4 = vcmp.eq.s32.totalorder %v521_v37, %v3738_v24 }
  0xa9   :  { %2930 = vmatmul.mubr.msk.bf16.vlgmr.msra.gmra.mrb[4].mxu0 %vm2506_vm12, %v3512_v27  ;;  %2974 = vmatpush3.bf16.msra.mxu1 %v3609_v3 }
  0xaa   :  { %2954 = vmatpush3.bf16.msra.mxu0 %v3609_v3  ;;  %2975 = vmatprep.subr.bf16.mxu1 %v3504_v5 }
  0xab   :  { %2955 = vmatprep.subr.bf16.mxu0 %v3504_v5  ;;  %2969 = vmatprep.mubr.msk.bf16.mxu0 %vm3506_vm0, %v3504_v5  ;;  %v524_v38 = vpop.permute.xlu1 %523 }
  0xac   :  { %2989 = vmatprep.mubr.msk.bf16.mxu1 %vm3506_vm0, %v3504_v5  ;;  %vm526_vm5 = vcmp.eq.s32.totalorder %v524_v38, %v3738_v24 }
  0xad   :  { %2976 = vmatpush3.bf16.msra.mxu1 %v3623_v6  ;;  %vm2526_vm8 = vmpackc.low %vm526_vm5, %vm525_vm4 }
  0xae   :  { %2956 = vmatpush3.bf16.msra.mxu0 %v3623_v6  ;;  %2977 = vmatprep.subr.bf16.mxu1 %v3504_v5 }
  0xaf   :  { %2957 = vmatprep.subr.bf16.mxu0 %v3504_v5 }
  0xb1   :  { %2978 = vmatpush3.bf16.msra.mxu1 %v3634_v7 }
  0xb2   :  { %2958 = vmatpush3.bf16.msra.mxu0 %v3634_v7  ;;  %2979 = vmatprep.subr.bf16.mxu1 %v3504_v5 }
  0xb3   :  { %2959 = vmatprep.subr.bf16.mxu0 %v3504_v5 }
  0xb5   :  { %2980 = vmatpush3.bf16.msra.mxu1 %v3649_v9 }
  0xb6   :  { %2960 = vmatpush3.bf16.msra.mxu0 %v3649_v9  ;;  %2981 = vmatprep.subr.bf16.mxu1 %v3504_v5 }
  0xb7   :  { %2961 = vmatprep.subr.bf16.mxu0 %v3504_v5 }
  0xb9   :  { %2982 = vmatpush3.bf16.msra.mxu1 %v3666_v11 }
  0xba   :  { %2962 = vmatpush3.bf16.msra.mxu0 %v3666_v11  ;;  %2983 = vmatprep.subr.bf16.mxu1 %v3504_v5 }
  0xbb   :  { %2963 = vmatprep.subr.bf16.mxu0 %v3504_v5 }
  0xbd   :  { %2984 = vmatpush3.bf16.msra.mxu1 %v3677_v14 }
  0xbe   :  { %2964 = vmatpush3.bf16.msra.mxu0 %v3677_v14  ;;  %2985 = vmatprep.subr.bf16.mxu1 %v3504_v5 }
  0xbf   :  { %2965 = vmatprep.subr.bf16.mxu0 %v3504_v5 }
  0xc1   :  { %2986 = vmatpush3.bf16.msra.mxu1 %v3688_v16 }
  0xc2   :  { %2966 = vmatpush3.bf16.msra.mxu0 %v3688_v16  ;;  %2987 = vmatprep.subr.bf16.mxu1 %v3504_v5 }
  0xc3   :  { %2967 = vmatprep.subr.bf16.mxu0 %v3504_v5 }
  0xc5   :  { %2988 = vmatpush3.bf16.msra.mxu1 %v3699_v17 }
  0xc6   :  { %2968 = vmatpush3.bf16.msra.mxu0 %v3699_v17  ;;  %3013 = vmatprep.subr.bf16.mxu1 %v3504_v5 }
  0xc7   :  { %2993 = vmatprep.subr.bf16.mxu0 %v3504_v5 }
  0xc8   :  { %2990 = vmatmul.mubr.msk.bf16.vlgmr.msra.gmra.mrb[8].mxu1 %vm2518_vm2, %v3512_v27 }
  0xc9   :  { %2970 = vmatmul.mubr.msk.bf16.vlgmr.msra.gmra.mrb[8].mxu0 %vm2514_vm3, %v3512_v27  ;;  %3014 = vmatpush3.bf16.msra.mxu1 %v3609_v3 }
  0xca   :  { %2994 = vmatpush3.bf16.msra.mxu0 %v3609_v3  ;;  %3015 = vmatprep.subr.bf16.mxu1 %v3504_v5 }
  0xcb   :  { %2995 = vmatprep.subr.bf16.mxu0 %v3504_v5  ;;  %3009 = vmatprep.mubr.msk.bf16.mxu0 %vm3506_vm0, %v3504_v5 }
  0xcc   :  { %3029 = vmatprep.mubr.msk.bf16.mxu1 %vm3506_vm0, %v3504_v5 }
  0xcd   :  { %3016 = vmatpush3.bf16.msra.mxu1 %v3623_v6 }
  0xce   :  { %2996 = vmatpush3.bf16.msra.mxu0 %v3623_v6  ;;  %3017 = vmatprep.subr.bf16.mxu1 %v3504_v5 }
  0xcf   :  { %2997 = vmatprep.subr.bf16.mxu0 %v3504_v5 }
  0xd1   :  { %3018 = vmatpush3.bf16.msra.mxu1 %v3634_v7 }
  0xd2   :  { %2998 = vmatpush3.bf16.msra.mxu0 %v3634_v7  ;;  %3019 = vmatprep.subr.bf16.mxu1 %v3504_v5 }
  0xd3   :  { %2999 = vmatprep.subr.bf16.mxu0 %v3504_v5 }
  0xd5   :  { %3020 = vmatpush3.bf16.msra.mxu1 %v3649_v9 }
  0xd6   :  { %3000 = vmatpush3.bf16.msra.mxu0 %v3649_v9  ;;  %3021 = vmatprep.subr.bf16.mxu1 %v3504_v5 }
  0xd7   :  { %3001 = vmatprep.subr.bf16.mxu0 %v3504_v5 }
  0xd9   :  { %3022 = vmatpush3.bf16.msra.mxu1 %v3666_v11 }
  0xda   :  { %3002 = vmatpush3.bf16.msra.mxu0 %v3666_v11  ;;  %3023 = vmatprep.subr.bf16.mxu1 %v3504_v5 }
  0xdb   :  { %3003 = vmatprep.subr.bf16.mxu0 %v3504_v5 }
  0xdd   :  { %3024 = vmatpush3.bf16.msra.mxu1 %v3677_v14 }
  0xde   :  { %3004 = vmatpush3.bf16.msra.mxu0 %v3677_v14  ;;  %3025 = vmatprep.subr.bf16.mxu1 %v3504_v5  ;;  %v3967_v14 = vld [vmem:[%s4462_s6] sm:$0xff]  }
  0xdf   :  { %3005 = vmatprep.subr.bf16.mxu0 %v3504_v5 }
  0xe1   :  { %3026 = vmatpush3.bf16.msra.mxu1 %v3688_v16 }
  0xe2   :  { %3006 = vmatpush3.bf16.msra.mxu0 %v3688_v16  ;;  %3027 = vmatprep.subr.bf16.mxu1 %v3504_v5  ;;  %v3974_v16 = vld [vmem:[%s4462_s6 + $0x8] sm:$0xff]  }
  0xe3   :  { %3007 = vmatprep.subr.bf16.mxu0 %v3504_v5 }
  0xe5   :  { %3028 = vmatpush3.bf16.msra.mxu1 %v3699_v17 }
  0xe6   :  { %3008 = vmatpush3.bf16.msra.mxu0 %v3699_v17  ;;  %3033 = vmatprep.subr.bf16.mxu1 %v3424_v40  ;;  %v3985_v17 = vld [vmem:[%s4462_s6 + $0x10] sm:$0xff]  }
  0xe7   :  { %744 = vmatprep.subr.bf16.mxu0 %v3423_v41 }
  0xe8   :  { %3030 = vmatmul.mubr.msk.bf16.vlgmr.msra.gmra.mrb[12].mxu1 %vm2526_vm8, %v3512_v27 }
  0xe9   :  { %3010 = vmatmul.mubr.msk.bf16.vlgmr.msra.gmra.mrb[12].mxu0 %vm2522_vm9, %v3512_v27  ;;  %3034 = vmatpush3.bf16.msra.mxu1 %v3424_v40 }
  0xea   :  { %745 = vmatpush1.bf16.msra.mxu0 %v3421_v42  ;;  %3035 = vmatprep.subr.bf16.mxu1 %v3428_v43 }
  0xeb   :  { %746 = vmatprep.subr.bf16.mxu0 %v3427_v44  ;;  %776 = vmatprep.mubr.bf16.mxu0 %v3503_v1 }
  0xed   :  { %3036 = vmatpush3.bf16.msra.mxu1 %v3428_v43 }
  0xee   :  { %747 = vmatpush1.bf16.msra.mxu0 %v3425_v45  ;;  %3037 = vmatprep.subr.bf16.mxu1 %v3432_v46 }
  0xef   :  { %748 = vmatprep.subr.bf16.mxu0 %v3431_v47 }
  0xf1   :  { %3038 = vmatpush3.bf16.msra.mxu1 %v3432_v46 }
  0xf2   :  { %749 = vmatpush1.bf16.msra.mxu0 %v3429_v48  ;;  %3039 = vmatprep.subr.bf16.mxu1 %v3436_v49 }
  0xf3   :  { %750 = vmatprep.subr.bf16.mxu0 %v3435_v50 }
  0xf5   :  { %3040 = vmatpush3.bf16.msra.mxu1 %v3436_v49 }
  0xf6   :  { %751 = vmatpush1.bf16.msra.mxu0 %v3433_v51  ;;  %3041 = vmatprep.subr.bf16.mxu1 %v3440_v52 }
  0xf7   :  { %752 = vmatprep.subr.bf16.mxu0 %v3439_v53 }
  0xf9   :  { %3042 = vmatpush3.bf16.msra.mxu1 %v3440_v52 }
  0xfa   :  { %753 = vmatpush1.bf16.msra.mxu0 %v3437_v54  ;;  %3043 = vmatprep.subr.bf16.mxu1 %v3444_v55 }
  0xfb   :  { %754 = vmatprep.subr.bf16.mxu0 %v3443_v56  ;;  %v1032_v56 = vpop.permute.xlu1 %1031 }
  0xfc   :  { %vm1034_vm10 = vcmp.eq.s32.totalorder %v1032_v56, %v3738_v24 }
  0xfd   :  { %3044 = vmatpush3.bf16.msra.mxu1 %v3444_v55 }
  0xfe   :  { %755 = vmatpush1.bf16.msra.mxu0 %v3441_v57  ;;  %3045 = vmatprep.subr.bf16.mxu1 %v3448_v58  ;;  %v1029_v57 = vpop.permute.xlu0 %1028 }
  0xff   :  { %756 = vmatprep.subr.bf16.mxu0 %v3447_v59  ;;  %vm1033_vm11 = vcmp.eq.s32.totalorder %v1029_v57, %v3738_v24 }
 0x100   :  { %vm2563_vm12 = vmpackc.low %vm1034_vm10, %vm1033_vm11 }
 0x101   :  { %3046 = vmatpush3.bf16.msra.mxu1 %v3448_v58  ;;  %v1133_v58 = vpop.permute.xlu1 %1132 }
 0x102   :  { %757 = vmatpush1.bf16.msra.mxu0 %v3445_v60  ;;  %3047 = vmatprep.subr.bf16.mxu1 %v3452_v61  ;;  %v1136_v59 = vpop.permute.xlu0 %1135  ;;  %vm1137_vm13 = vcmp.eq.s32.totalorder %v1133_v58, %v3738_v24 }
 0x103   :  { %758 = vmatprep.subr.bf16.mxu0 %v3451_v62  ;;  %vm1138_vm14 = vcmp.eq.s32.totalorder %v1136_v59, %v3738_v24 }
 0x104   :  { %vm2567_vm15 = vmpackc.low %vm1138_vm14, %vm1137_vm13 }
 0x105   :  { %3048 = vmatpush3.bf16.msra.mxu1 %v3452_v61  ;;  %v1190_v60 = vpop.permute.xlu1 %1189 }
 0x106   :  { %759 = vmatpush1.bf16.msra.mxu0 %v3449_v63  ;;  %3065 = vmatprep.subr.bf16.mxu1 %v3504_v5  ;;  %vm1194_vm1 = vcmp.eq.s32.totalorder %v1190_v60, %v3738_v24  ;;  %v1247_v63 = vpop.permute.xlu0 %1246 }
 0x107   :  { %3085 = vmatprep.subr.bf16.mxu0 %v3504_v5  ;;  %vm1251_vm5 = vcmp.eq.s32.totalorder %v1247_v63, %v3738_v24 }
 0x109   :  { %v1193_v61 = vpop.permute.xlu1 %1192 }
 0x10a   :  { %vm1195_vm2 = vcmp.eq.s32.totalorder %v1193_v61, %v3738_v24  ;;  %v1307_v2 = vpop.permute.xlu0 %1306 }
 0x10b   :  { %vm2571_vm3 = vmpackc.low %vm1195_vm2, %vm1194_vm1  ;;  %vm1309_vm8 = vcmp.eq.s32.totalorder %v1307_v2, %v3738_v24 }
 0x10d   :  { %v1250_v62 = vpop.permute.xlu1 %1249 }
 0x10e   :  { %vm1252_vm4 = vcmp.eq.s32.totalorder %v1250_v62, %v3738_v24 }
 0x10f   :  { %vm2575_vm6 = vmpackc.low %vm1252_vm4, %vm1251_vm5 }
 0x111   :  { %v1304_v0 = vpop.permute.xlu1 %1303 }
 0x112   :  { %vm1308_vm7 = vcmp.eq.s32.totalorder %v1304_v0, %v3738_v24 }
 0x113   :  { %vm2579_vm9 = vmpackc.low %vm1309_vm8, %vm1308_vm7 }
 0x15b   :  { %v224_v3 = vpop.f32.mrb[0].mxu1 }
 0x15c   :  { %v168_v4 = vpop.f32.mrb[0].mxu0  ;;  %v2911_v6 = vpop.f32.mrb[1].mxu1 }
 0x15d   :  { %v2891_v7 = vpop.f32.mrb[1].mxu0  ;;  %v227_v8 = vpop.f32.mrb[2].mxu1 }
 0x15e   :  { %v171_v9 = vpop.f32.mrb[2].mxu0  ;;  %v231_v10 = vpack.c.bf16 %v227_v8, %v224_v3  ;;  %v2912_v11 = vpop.f32.mrb[3].mxu1 }
 0x15f   :  { %v175_v12 = vpack.c.bf16 %v171_v9, %v168_v4  ;;  %v2892_v13 = vpop.f32.mrb[3].mxu0  ;;  %v1361_v3 = vpop.permute.xlu1 %1360 }
 0x160   :  { %vm1365_vm10 = vcmp.eq.s32.totalorder %v1361_v3, %v3738_v24  ;;  %v1418_v7 = vpop.permute.xlu0 %1417 }
 0x161   :  { %777 = vmatmul.mubr.bf16.vlgmr.msra.gmra.mrb[16].mxu0 %v175_v12  ;;  %3049 = vmatprep.mubr.bf16.mxu1 %v175_v12  ;;  %vm1422_vm14 = vcmp.eq.s32.totalorder %v1418_v7, %v3738_v24 }
 0x162   :  { %3050 = vmatmul.mubr.bf16.vlgmr.msra.gmra.mrb[16].mxu1 %v231_v10  ;;  %784 = vmatprep.mubr.bf16.mxu0 %v3503_v1 }
 0x163   :  { %3086 = vmatpush3.bf16.msra.mxu0 %v3967_v14  ;;  %3066 = vmatpush3.bf16.msra.mxu1 %v3967_v14  ;;  %v1364_v4 = vpop.permute.xlu1 %1363 }
 0x164   :  { %3087 = vmatprep.subr.bf16.mxu0 %v3504_v5  ;;  %3067 = vmatprep.subr.bf16.mxu1 %v3504_v5  ;;  %vm1366_vm11 = vcmp.eq.s32.totalorder %v1364_v4, %v3738_v24  ;;  %v1478_v9 = vpop.permute.xlu0 %1477 }
 0x165   :  { %vm1480_vm2 = vcmp.eq.s32.totalorder %v1478_v9, %v3738_v24  ;;  %v3466_v9 = vld [vmem:[%s4463_s7 + $0x1c] ss:$12 sps:$4 sm:$0xff]  }
 0x167   :  { %3088 = vmatpush3.bf16.msra.mxu0 %v3974_v16  ;;  %3068 = vmatpush3.bf16.msra.mxu1 %v3974_v16  ;;  %v1421_v6 = vpop.permute.xlu1 %1420 }
 0x168   :  { %3089 = vmatprep.subr.bf16.mxu0 %v3504_v5  ;;  %3069 = vmatprep.subr.bf16.mxu1 %v3504_v5  ;;  %vm1423_vm13 = vcmp.eq.s32.totalorder %v1421_v6, %v3738_v24 }
 0x169   :  { %785 = vmatmul.mubr.bf16.gmra.mrb[20].mxu0 %v231_v10 }
 0x16a   :  { %794 = vmatprep.mubr.bf16.mxu0 %v3503_v1 }
 0x16b   :  { %3090 = vmatpush3.bf16.msra.mxu0 %v3985_v17  ;;  %3070 = vmatpush3.bf16.msra.mxu1 %v3985_v17  ;;  %v1475_v8 = vpop.permute.xlu1 %1474 }
 0x16c   :  { %3091 = vmatprep.subr.bf16.mxu0 %v3504_v5  ;;  %3071 = vmatprep.subr.bf16.mxu1 %v3504_v5  ;;  %vm1479_vm1 = vcmp.eq.s32.totalorder %v1475_v8, %v3738_v24 }
 0x16f   :  { %3092 = vmatpush3.bf16.msra.mxu0 %v3996_v21  ;;  %3072 = vmatpush3.bf16.msra.mxu1 %v3996_v21 }
 0x170   :  { %3093 = vmatprep.subr.bf16.mxu0 %v3504_v5  ;;  %3073 = vmatprep.subr.bf16.mxu1 %v3504_v5 }
 0x173   :  { %3094 = vmatpush3.bf16.msra.mxu0 %v4006_v20  ;;  %3074 = vmatpush3.bf16.msra.mxu1 %v4006_v20 }
 0x174   :  { %3095 = vmatprep.subr.bf16.mxu0 %v3504_v5  ;;  %3075 = vmatprep.subr.bf16.mxu1 %v3504_v5 }
 0x177   :  { %3096 = vmatpush3.bf16.msra.mxu0 %v4015_v22  ;;  %3076 = vmatpush3.bf16.msra.mxu1 %v4015_v22 }
 0x178   :  { %3097 = vmatprep.subr.bf16.mxu0 %v3504_v5  ;;  %3077 = vmatprep.subr.bf16.mxu1 %v3504_v5 }
 0x17b   :  { %v338_v23 = vpop.f32.mrb[4].mxu1  ;;  %3098 = vmatpush3.bf16.msra.mxu0 %v4025_v19  ;;  %3078 = vmatpush3.bf16.msra.mxu1 %v4025_v19 }
 0x17c   :  { %v281_v26 = vpop.f32.mrb[4].mxu0  ;;  %v2951_v28 = vpop.f32.mrb[5].mxu1  ;;  %3079 = vmatprep.subr.bf16.mxu1 %v3504_v5  ;;  %3099 = vmatprep.subr.bf16.mxu0 %v3504_v5 }
 0x17d   :  { %v2931_v29 = vpop.f32.mrb[5].mxu0  ;;  %v341_v30 = vpop.f32.mrb[6].mxu1  ;;  %v4202_v28 = vld [vmem:[%s4464_s5] ss:$0 sm:$0xff] }
 0x17e   :  { %v284_v31 = vpop.f32.mrb[6].mxu0  ;;  %v345_v32 = vpack.c.bf16 %v341_v30, %v338_v23  ;;  %v2952_v33 = vpop.f32.mrb[7].mxu1 }
 0x17f   :  { %v288_v34 = vpack.c.bf16 %v284_v31, %v281_v26  ;;  %v2932_v35 = vpop.f32.mrb[7].mxu0  ;;  %3080 = vmatpush3.bf16.msra.mxu1 %v4034_v25  ;;  %3100 = vmatpush3.bf16.msra.mxu0 %v4034_v25  ;;  %v1532_v29 = vpop.permute.xlu1 %1531 }
 0x180   :  { %3105 = vmatprep.subr.bf16.mxu1 %v3504_v5  ;;  %3125 = vmatprep.subr.bf16.mxu0 %v3504_v5  ;;  %vm1536_vm4 = vcmp.eq.s32.totalorder %v1532_v29, %v3738_v24 }
 0x181   :  { %795 = vmatmul.mubr.bf16.gmra.mrb[24].mxu0 %v288_v34  ;;  %3053 = vmatprep.mubr.bf16.mxu1 %v288_v34 }
 0x182   :  { %3054 = vmatmul.mubr.bf16.gmra.mrb[20].mxu1 %v345_v32  ;;  %804 = vmatprep.mubr.bf16.mxu0 %v3503_v1 }
 0x189   :  { %805 = vmatmul.mubr.bf16.gmra.mrb[28].mxu0 %v345_v32 }
 0x18a   :  { %814 = vmatprep.mubr.bf16.mxu0 %v3503_v1 }
 0x19b   :  { %v452_v36 = vpop.f32.mrb[8].mxu1 }
 0x19c   :  { %v395_v37 = vpop.f32.mrb[8].mxu0  ;;  %v2991_v38 = vpop.f32.mrb[9].mxu1 }
 0x19d   :  { %v2971_v39 = vpop.f32.mrb[9].mxu0  ;;  %v455_v40 = vpop.f32.mrb[10].mxu1 }
 0x19e   :  { %v398_v41 = vpop.f32.mrb[10].mxu0  ;;  %v459_v42 = vpack.c.bf16 %v455_v40, %v452_v36  ;;  %v2992_v43 = vpop.f32.mrb[11].mxu1 }
 0x19f   :  { %v402_v44 = vpack.c.bf16 %v398_v41, %v395_v37  ;;  %v2972_v45 = vpop.f32.mrb[11].mxu0  ;;  %v1535_v38 = vpop.permute.xlu1 %1534 }
 0x1a0   :  { %vm1537_vm5 = vcmp.eq.s32.totalorder %v1535_v38, %v3738_v24  ;;  %v1589_v40 = vpop.permute.xlu0 %1588  ;;  %v3479_v38 = vld [vmem:[%s4463_s7 + $0x50] ss:$12 sps:$4 sm:$0xff]  }
 0x1a1   :  { %815 = vmatmul.mubr.bf16.gmra.mrb[32].mxu0 %v402_v44  ;;  %3057 = vmatprep.mubr.bf16.mxu1 %v402_v44  ;;  %vm1593_vm8 = vcmp.eq.s32.totalorder %v1589_v40, %v3738_v24 }
 0x1a2   :  { %3058 = vmatmul.mubr.bf16.gmra.mrb[24].mxu1 %v459_v42  ;;  %824 = vmatprep.mubr.bf16.mxu0 %v3503_v1 }
 0x1a3   :  { %v1592_v39 = vpop.permute.xlu1 %1591 }
 0x1a4   :  { %vm1594_vm7 = vcmp.eq.s32.totalorder %v1592_v39, %v3738_v24  ;;  %v1649_v7 = vpop.permute.xlu0 %1648 }
 0x1a7   :  { %v1646_v3 = vpop.permute.xlu1 %1645 }
 0x1a9   :  { %825 = vmatmul.mubr.bf16.gmra.mrb[36].mxu0 %v459_v42 }
 0x1aa   :  { %834 = vmatprep.mubr.bf16.mxu0 %v3503_v1 }
 0x1ab   :  { %v1703_v8 = vpop.permute.xlu1 %1702 }
 0x1bb   :  { %v566_v46 = vpop.f32.mrb[12].mxu1 }
 0x1bc   :  { %v509_v47 = vpop.f32.mrb[12].mxu0  ;;  %v3031_v48 = vpop.f32.mrb[13].mxu1 }
 0x1bd   :  { %v3011_v49 = vpop.f32.mrb[13].mxu0  ;;  %v569_v50 = vpop.f32.mrb[14].mxu1 }
 0x1be   :  { %v512_v51 = vpop.f32.mrb[14].mxu0  ;;  %v573_v52 = vpack.c.bf16 %v569_v50, %v566_v46  ;;  %v3032_v53 = vpop.f32.mrb[15].mxu1 }
 0x1bf   :  { %v516_v54 = vpack.c.bf16 %v512_v51, %v509_v47  ;;  %v3012_v55 = vpop.f32.mrb[15].mxu0 }
 0x1c1   :  { %835 = vmatmul.mubr.bf16.gmra.mrb[40].mxu0 %v516_v54  ;;  %3061 = vmatprep.mubr.bf16.mxu1 %v516_v54 }
 0x1c2   :  { %3062 = vmatmul.mubr.bf16.gmra.mrb[28].mxu1 %v573_v52  ;;  %842 = vmatprep.mubr.bf16.mxu0 %v3503_v1 }
 0x1c3   :  { %3081 = vmatprep.mubr.msk.bf16.mxu1 %vm3506_vm0, %v3504_v5 }
 0x1c9   :  { %843 = vmatmul.mubr.bf16.gmra.mrb[44].mxu0 %v573_v52 }
 0x1ca   :  { %3082 = vmatmul.mubr.msk.bf16.vlgmr.msra.gmra.mrb[32].mxu1 %vm2563_vm12, %v3512_v27  ;;  %3101 = vmatprep.mubr.msk.bf16.mxu0 %vm3506_vm0, %v3504_v5  ;;  %vm2583_vm12 = vmpackc.low %vm1366_vm11, %vm1365_vm10  ;;  %vm1650_vm10 = vcmp.eq.s32.totalorder %v1646_v3, %v3738_v24  ;;  %vm1651_vm11 = vcmp.eq.s32.totalorder %v1649_v7, %v3738_v24  ;;  %v3492_v3 = vld [vmem:[%s4463_s7 + $0xb0] ss:$12 sps:$4 sm:$0xff]  }
 0x1cb   :  { %3106 = vmatpush3.bf16.msra.mxu1 %v3967_v14  ;;  %3121 = vmatprep.mubr.msk.bf16.mxu1 %vm3506_vm0, %v3504_v5 }
 0x1cc   :  { %3107 = vmatprep.subr.bf16.mxu1 %v3504_v5 }
 0x1cf   :  { %3108 = vmatpush3.bf16.msra.mxu1 %v3974_v16 }
 0x1d0   :  { %3109 = vmatprep.subr.bf16.mxu1 %v3504_v5 }
 0x1d1   :  { %3102 = vmatmul.mubr.msk.bf16.vlgmr.msra.gmra.mrb[48].mxu0 %vm2567_vm15, %v3512_v27  ;;  %vm2587_vm15 = vmpackc.low %vm1423_vm13, %vm1422_vm14  ;;  %vm1707_vm13 = vcmp.eq.s32.totalorder %v1703_v8, %v3738_v24 }
 0x1d2   :  { %3126 = vmatpush3.bf16.msra.mxu0 %v3967_v14  ;;  %3141 = vmatprep.mubr.msk.bf16.mxu0 %vm3506_vm0, %v3504_v5 }
 0x1d3   :  { %3110 = vmatpush3.bf16.msra.mxu1 %v3985_v17  ;;  %3127 = vmatprep.subr.bf16.mxu0 %v3504_v5 }
 0x1d4   :  { %3111 = vmatprep.subr.bf16.mxu1 %v3504_v5 }
 0x1d6   :  { %3128 = vmatpush3.bf16.msra.mxu0 %v3974_v16 }
 0x1d7   :  { %3112 = vmatpush3.bf16.msra.mxu1 %v3996_v21  ;;  %3129 = vmatprep.subr.bf16.mxu0 %v3504_v5 }
 0x1d8   :  { %3113 = vmatprep.subr.bf16.mxu1 %v3504_v5 }
 0x1da   :  { %3130 = vmatpush3.bf16.msra.mxu0 %v3985_v17 }
 0x1db   :  { %3114 = vmatpush3.bf16.msra.mxu1 %v4006_v20  ;;  %3131 = vmatprep.subr.bf16.mxu0 %v3504_v5 }
 0x1dc   :  { %3115 = vmatprep.subr.bf16.mxu1 %v3504_v5 }
 0x1de   :  { %3132 = vmatpush3.bf16.msra.mxu0 %v3996_v21 }
 0x1df   :  { %3116 = vmatpush3.bf16.msra.mxu1 %v4015_v22  ;;  %3133 = vmatprep.subr.bf16.mxu0 %v3504_v5 }
 0x1e0   :  { %3117 = vmatprep.subr.bf16.mxu1 %v3504_v5 }
 0x1e2   :  { %3134 = vmatpush3.bf16.msra.mxu0 %v4006_v20 }
 0x1e3   :  { %3118 = vmatpush3.bf16.msra.mxu1 %v4025_v19  ;;  %3135 = vmatprep.subr.bf16.mxu0 %v3504_v5 }
 0x1e4   :  { %3119 = vmatprep.subr.bf16.mxu1 %v3504_v5 }
 0x1e6   :  { %3136 = vmatpush3.bf16.msra.mxu0 %v4015_v22 }
 0x1e7   :  { %3120 = vmatpush3.bf16.msra.mxu1 %v4034_v25  ;;  %3137 = vmatprep.subr.bf16.mxu0 %v3504_v5 }
 0x1e8   :  { %3145 = vmatprep.subr.bf16.mxu1 %v3504_v5 }
 0x1ea   :  { %3122 = vmatmul.mubr.msk.bf16.vlgmr.msra.gmra.mrb[36].mxu1 %vm2571_vm3, %v3512_v27  ;;  %3138 = vmatpush3.bf16.msra.mxu0 %v4025_v19  ;;  %vm2591_vm3 = vmpackc.low %vm1480_vm2, %vm1479_vm1 }
 0x1eb   :  { %3146 = vmatpush3.bf16.msra.mxu1 %v3967_v14  ;;  %3139 = vmatprep.subr.bf16.mxu0 %v3504_v5 }
 0x1ec   :  { %3147 = vmatprep.subr.bf16.mxu1 %v3504_v5  ;;  %3161 = vmatprep.mubr.msk.bf16.mxu1 %vm3506_vm0, %v3504_v5 }
 0x1ee   :  { %3140 = vmatpush3.bf16.msra.mxu0 %v4034_v25 }
 0x1ef   :  { %3148 = vmatpush3.bf16.msra.mxu1 %v3974_v16  ;;  %3165 = vmatprep.subr.bf16.mxu0 %v3504_v5 }
 0x1f0   :  { %3149 = vmatprep.subr.bf16.mxu1 %v3504_v5 }
 0x1f1   :  { %3142 = vmatmul.mubr.msk.bf16.vlgmr.msra.gmra.mrb[52].mxu0 %vm2575_vm6, %v3512_v27  ;;  %vm2595_vm6 = vmpackc.low %vm1537_vm5, %vm1536_vm4 }
 0x1f2   :  { %3166 = vmatpush3.bf16.msra.mxu0 %v3967_v14  ;;  %3181 = vmatprep.mubr.msk.bf16.mxu0 %vm3506_vm0, %v3504_v5 }
 0x1f3   :  { %3150 = vmatpush3.bf16.msra.mxu1 %v3985_v17  ;;  %3167 = vmatprep.subr.bf16.mxu0 %v3504_v5 }
 0x1f4   :  { %3151 = vmatprep.subr.bf16.mxu1 %v3504_v5 }
 0x1f6   :  { %3168 = vmatpush3.bf16.msra.mxu0 %v3974_v16 }
 0x1f7   :  { %3152 = vmatpush3.bf16.msra.mxu1 %v3996_v21  ;;  %3169 = vmatprep.subr.bf16.mxu0 %v3504_v5 }
 0x1f8   :  { %3153 = vmatprep.subr.bf16.mxu1 %v3504_v5 }
 0x1fa   :  { %3170 = vmatpush3.bf16.msra.mxu0 %v3985_v17 }
 0x1fb   :  { %3154 = vmatpush3.bf16.msra.mxu1 %v4006_v20  ;;  %3171 = vmatprep.subr.bf16.mxu0 %v3504_v5 }
 0x1fc   :  { %3155 = vmatprep.subr.bf16.mxu1 %v3504_v5 }
 0x1fe   :  { %3172 = vmatpush3.bf16.msra.mxu0 %v3996_v21 }
 0x1ff   :  { %3156 = vmatpush3.bf16.msra.mxu1 %v4015_v22  ;;  %3173 = vmatprep.subr.bf16.mxu0 %v3504_v5 }
 0x200   :  { %3157 = vmatprep.subr.bf16.mxu1 %v3504_v5 }
 0x202   :  { %3174 = vmatpush3.bf16.msra.mxu0 %v4006_v20 }
 0x203   :  { %3158 = vmatpush3.bf16.msra.mxu1 %v4025_v19  ;;  %3175 = vmatprep.subr.bf16.mxu0 %v3504_v5 }
 0x204   :  { %3159 = vmatprep.subr.bf16.mxu1 %v3504_v5 }
 0x206   :  { %3176 = vmatpush3.bf16.msra.mxu0 %v4015_v22 }
 0x207   :  { %3160 = vmatpush3.bf16.msra.mxu1 %v4034_v25  ;;  %3177 = vmatprep.subr.bf16.mxu0 %v3504_v5 }
 0x208   :  { %3185 = vmatprep.subr.bf16.mxu1 %v3504_v5 }
 0x20a   :  { %3162 = vmatmul.mubr.msk.bf16.vlgmr.msra.gmra.mrb[40].mxu1 %vm2579_vm9, %v3512_v27  ;;  %3178 = vmatpush3.bf16.msra.mxu0 %v4025_v19  ;;  %vm2599_vm9 = vmpackc.low %vm1594_vm7, %vm1593_vm8 }
 0x20b   :  { %3186 = vmatpush3.bf16.msra.mxu1 %v3967_v14  ;;  %3179 = vmatprep.subr.bf16.mxu0 %v3504_v5 }
 0x20c   :  { %3187 = vmatprep.subr.bf16.mxu1 %v3504_v5  ;;  %3201 = vmatprep.mubr.msk.bf16.mxu1 %vm3506_vm0, %v3504_v5 }
 0x20e   :  { %3180 = vmatpush3.bf16.msra.mxu0 %v4034_v25 }
 0x20f   :  { %3188 = vmatpush3.bf16.msra.mxu1 %v3974_v16  ;;  %3205 = vmatprep.subr.bf16.mxu0 %v3504_v5 }
 0x210   :  { %3189 = vmatprep.subr.bf16.mxu1 %v3504_v5 }
 0x211   :  { %3182 = vmatmul.mubr.msk.bf16.vlgmr.msra.gmra.mrb[56].mxu0 %vm2583_vm12, %v3512_v27  ;;  %vm2603_vm12 = vmpackc.low %vm1651_vm11, %vm1650_vm10 }
 0x212   :  { %3206 = vmatpush3.bf16.msra.mxu0 %v3967_v14  ;;  %3221 = vmatprep.mubr.msk.bf16.mxu0 %vm3506_vm0, %v3504_v5 }
 0x213   :  { %3190 = vmatpush3.bf16.msra.mxu1 %v3985_v17  ;;  %3207 = vmatprep.subr.bf16.mxu0 %v3504_v5 }
 0x214   :  { %3191 = vmatprep.subr.bf16.mxu1 %v3504_v5 }
 0x216   :  { %3208 = vmatpush3.bf16.msra.mxu0 %v3974_v16 }
 0x217   :  { %3192 = vmatpush3.bf16.msra.mxu1 %v3996_v21  ;;  %3209 = vmatprep.subr.bf16.mxu0 %v3504_v5 }
 0x218   :  { %3193 = vmatprep.subr.bf16.mxu1 %v3504_v5 }
 0x21a   :  { %3210 = vmatpush3.bf16.msra.mxu0 %v3985_v17 }
 0x21b   :  { %3194 = vmatpush3.bf16.msra.mxu1 %v4006_v20  ;;  %3211 = vmatprep.subr.bf16.mxu0 %v3504_v5 }
 0x21c   :  { %3195 = vmatprep.subr.bf16.mxu1 %v3504_v5 }
 0x21e   :  { %3212 = vmatpush3.bf16.msra.mxu0 %v3996_v21 }
 0x21f   :  { %3196 = vmatpush3.bf16.msra.mxu1 %v4015_v22  ;;  %3213 = vmatprep.subr.bf16.mxu0 %v3504_v5 }
 0x220   :  { %3197 = vmatprep.subr.bf16.mxu1 %v3504_v5 }
 0x222   :  { %3214 = vmatpush3.bf16.msra.mxu0 %v4006_v20 }
 0x223   :  { %3198 = vmatpush3.bf16.msra.mxu1 %v4025_v19  ;;  %3215 = vmatprep.subr.bf16.mxu0 %v3504_v5 }
 0x224   :  { %3199 = vmatprep.subr.bf16.mxu1 %v3504_v5 }
 0x226   :  { %3216 = vmatpush3.bf16.msra.mxu0 %v4015_v22 }
 0x227   :  { %3200 = vmatpush3.bf16.msra.mxu1 %v4034_v25  ;;  %3217 = vmatprep.subr.bf16.mxu0 %v3504_v5 }
 0x228   :  { %3225 = vmatprep.subr.bf16.mxu1 %v3504_v5 }
 0x22a   :  { %3202 = vmatmul.mubr.msk.bf16.vlgmr.msra.gmra.mrb[44].mxu1 %vm2587_vm15, %v3512_v27  ;;  %3218 = vmatpush3.bf16.msra.mxu0 %v4025_v19 }
 0x22b   :  { %3226 = vmatpush3.bf16.msra.mxu1 %v3967_v14  ;;  %3219 = vmatprep.subr.bf16.mxu0 %v3504_v5 }
 0x22c   :  { %3227 = vmatprep.subr.bf16.mxu1 %v3504_v5  ;;  %3241 = vmatprep.mubr.msk.bf16.mxu1 %vm3506_vm0, %v3504_v5 }
 0x22e   :  { %3220 = vmatpush3.bf16.msra.mxu0 %v4034_v25 }
 0x22f   :  { %3228 = vmatpush3.bf16.msra.mxu1 %v3974_v16  ;;  %3245 = vmatprep.subr.bf16.mxu0 %v3504_v5 }
 0x230   :  { %3229 = vmatprep.subr.bf16.mxu1 %v3504_v5 }
 0x231   :  { %3222 = vmatmul.mubr.msk.bf16.vlgmr.msra.gmra.mrb[60].mxu0 %vm2591_vm3, %v3512_v27 }
 0x232   :  { %3246 = vmatpush3.bf16.msra.mxu0 %v3967_v14  ;;  %3261 = vmatprep.mubr.msk.bf16.mxu0 %vm3506_vm0, %v3504_v5 }
 0x233   :  { %3230 = vmatpush3.bf16.msra.mxu1 %v3985_v17  ;;  %3247 = vmatprep.subr.bf16.mxu0 %v3504_v5 }
 0x234   :  { %v778_v10 = vpop.f32.mrb[16].mxu0  ;;  %3231 = vmatprep.subr.bf16.mxu1 %v3504_v5 }
 0x235   :  { %v780_v11 = vpop.f32.mrb[17].mxu0  ;;  %v3051_v12 = vpop.f32.mrb[16].mxu1  ;;  %v949_v30 = vadd.f32 %v4202_v28, %v778_v10 }
 0x236   :  { %3248 = vmatpush3.bf16.msra.mxu0 %v3974_v16  ;;  %v781_v13 = vpop.f32.mrb[18].mxu0  ;;  %v883_v15 = vpop.f32.mrb[17].mxu1  ;;  %v3467_v11 = vld [vmem:[%s4463_s7 + $0x8] ss:$12 sps:$4 sm:$0xff]  }
 0x237   :  { %3232 = vmatpush3.bf16.msra.mxu1 %v3996_v21  ;;  %v783_v18 = vpop.f32.mrb[19].mxu0  ;;  %v3052_v23 = vpop.f32.mrb[18].mxu1  ;;  %3249 = vmatprep.subr.bf16.mxu0 %v3504_v5  ;;  %v950_v33 = vadd.f32 %v4202_v28, %v781_v13  ;;  %v3470_v12 = vld [vmem:[%s4463_s7 + $0x34] ss:$12 sps:$4 sm:$0xff]   ;;  %v3474_v15 = vld [vmem:[%s4463_s7 + $0x4c] ss:$12 sps:$4 sm:$0xff]  }
 0x238   :  { %v885_v26 = vpop.f32.mrb[19].mxu1  ;;  %3233 = vmatprep.subr.bf16.mxu1 %v3504_v5  ;;  %v1706_v10 = vpop.permute.xlu1 %1705  ;;  %v3471_v13 = vld [vmem:[%s4463_s7 + $0x20] ss:$12 sps:$4 sm:$0xff]  }
 0x239   :  { %vm1708_vm14 = vcmp.eq.s32.totalorder %v1706_v10, %v3738_v24  ;;  %v3472_v24 = vld [vmem:[%s4463_s7 + $0x48] ss:$12 sps:$4 sm:$0xff]   ;;  %v3478_v26 = vld [vmem:[%s4463_s7 + $0x64] ss:$12 sps:$4 sm:$0xff]  }
 0x23a   :  { %3250 = vmatpush3.bf16.msra.mxu0 %v3985_v17  ;;  %vm2607_vm15 = vmpackc.low %vm1708_vm14, %vm1707_vm13 }
 0x23b   :  { %3234 = vmatpush3.bf16.msra.mxu1 %v4006_v20  ;;  %3251 = vmatprep.subr.bf16.mxu0 %v3504_v5 }
 0x23c   :  { %v786_v31 = vpop.f32.mrb[20].mxu0  ;;  %3235 = vmatprep.subr.bf16.mxu1 %v3504_v5 }
 0x23d   :  { %v788_v32 = vpop.f32.mrb[21].mxu0  ;;  %v951_v41 = vadd.f32 %v4202_v28, %v786_v31 }
 0x23e   :  { %3252 = vmatpush3.bf16.msra.mxu0 %v3996_v21  ;;  %v961_v34 = vadd.f32 %v949_v30, %v788_v32  ;;  %v790_v35 = vpop.f32.mrb[22].mxu0 }
 0x23f   :  { %3236 = vmatpush3.bf16.msra.mxu1 %v4015_v22  ;;  %v792_v36 = vpop.f32.mrb[23].mxu0  ;;  %3253 = vmatprep.subr.bf16.mxu0 %v3504_v5  ;;  %v952_v45 = vadd.f32 %v4202_v28, %v790_v35 }
 0x240   :  { %v962_v37 = vadd.f32 %v950_v33, %v792_v36  ;;  %3237 = vmatprep.subr.bf16.mxu1 %v3504_v5 }
 0x242   :  { %3254 = vmatpush3.bf16.msra.mxu0 %v4006_v20 }
 0x243   :  { %3238 = vmatpush3.bf16.msra.mxu1 %v4025_v19  ;;  %3255 = vmatprep.subr.bf16.mxu0 %v3504_v5 }
 0x244   :  { %3239 = vmatprep.subr.bf16.mxu1 %v3504_v5 }
 0x246   :  { %3256 = vmatpush3.bf16.msra.mxu0 %v4015_v22 }
 0x247   :  { %3240 = vmatpush3.bf16.msra.mxu1 %v4034_v25  ;;  %3257 = vmatprep.subr.bf16.mxu0 %v3504_v5 }
 0x248   :  { %3265 = vmatprep.subr.bf16.mxu1 %v3504_v5 }
 0x24a   :  { %3242 = vmatmul.mubr.msk.bf16.vlgmr.msra.gmra.mrb[48].mxu1 %vm2595_vm6, %v3512_v27  ;;  %3258 = vmatpush3.bf16.msra.mxu0 %v4025_v19 }
 0x24b   :  { %3266 = vmatpush3.bf16.msra.mxu1 %v3967_v14  ;;  %3259 = vmatprep.subr.bf16.mxu0 %v3504_v5 }
 0x24c   :  { %3267 = vmatprep.subr.bf16.mxu1 %v3504_v5  ;;  %3281 = vmatprep.mubr.msk.bf16.mxu1 %vm3506_vm0, %v3504_v5 }
 0x24e   :  { %3260 = vmatpush3.bf16.msra.mxu0 %v4034_v25 }
 0x24f   :  { %3268 = vmatpush3.bf16.msra.mxu1 %v3974_v16  ;;  %3285 = vmatprep.subr.bf16.mxu0 %v3504_v5 }
 0x250   :  { %3269 = vmatprep.subr.bf16.mxu1 %v3504_v5 }
 0x251   :  { %3262 = vmatmul.mubr.msk.bf16.vlgmr.msra.gmra.mrb[64].mxu0 %vm2599_vm9, %v3512_v27 }
 0x252   :  { %3286 = vmatpush3.bf16.msra.mxu0 %v3967_v14  ;;  %3301 = vmatprep.mubr.msk.bf16.mxu0 %vm3506_vm0, %v3504_v5 }
 0x253   :  { %3270 = vmatpush3.bf16.msra.mxu1 %v3985_v17  ;;  %3287 = vmatprep.subr.bf16.mxu0 %v3504_v5 }
 0x254   :  { %v796_v42 = vpop.f32.mrb[24].mxu0  ;;  %3271 = vmatprep.subr.bf16.mxu1 %v3504_v5 }
 0x255   :  { %v798_v43 = vpop.f32.mrb[25].mxu0  ;;  %v3055_v44 = vpop.f32.mrb[20].mxu1  ;;  %v953_v58 = vadd.f32 %v4202_v28, %v796_v42  ;;  %v3482_v42 = vld [vmem:[%s4463_s7 + $0x7c] ss:$12 sps:$4 sm:$0xff]  }
 0x256   :  { %v963_v46 = vadd.f32 %v951_v41, %v798_v43  ;;  %3288 = vmatpush3.bf16.msra.mxu0 %v3974_v16  ;;  %v800_v14 = vpop.f32.mrb[26].mxu0  ;;  %v895_v47 = vpop.f32.mrb[21].mxu1 }
 0x257   :  { %v973_v48 = vadd.f32 %v961_v34, %v895_v47  ;;  %3272 = vmatpush3.bf16.msra.mxu1 %v3996_v21  ;;  %v802_v49 = vpop.f32.mrb[27].mxu0  ;;  %v3056_v50 = vpop.f32.mrb[22].mxu1  ;;  %3289 = vmatprep.subr.bf16.mxu0 %v3504_v5  ;;  %v954_v63 = vadd.f32 %v4202_v28, %v800_v14 }
 0x258   :  { %v975_v51 = vadd.f32 %v3055_v44, %v963_v46  ;;  %v964_v52 = vadd.f32 %v952_v45, %v802_v49  ;;  %v898_v53 = vpop.f32.mrb[23].mxu1  ;;  %3273 = vmatprep.subr.bf16.mxu1 %v3504_v5  ;;  %v3483_v49 = vld [vmem:[%s4463_s7 + $0x68] ss:$12 sps:$4 sm:$0xff]  }
 0x259   :  { %v985_v54 = vmax.f32 %v973_v48, 0.0  ;;  %v974_v55 = vadd.f32 %v962_v37, %v898_v53  ;;  %v3476_v37 = vld [vmem:[%s4463_s7 + $0x60] ss:$12 sps:$4 sm:$0xff]   ;;  %v3480_v48 = vld [vmem:[%s4463_s7 + $0x78] ss:$12 sps:$4 sm:$0xff]  }
 0x25a   :  { %v987_v56 = vmax.f32 %v975_v51, 0.0  ;;  %v976_v57 = vadd.f32 %v3056_v50, %v964_v52  ;;  %3290 = vmatpush3.bf16.msra.mxu0 %v3985_v17  ;;  %v3486_v53 = vld [vmem:[%s4463_s7 + $0x94] ss:$12 sps:$4 sm:$0xff]  }
 0x25b   :  { %v986_v16 = vmax.f32 %v974_v55, 0.0  ;;  %3274 = vmatpush3.bf16.msra.mxu1 %v4006_v20  ;;  %3291 = vmatprep.subr.bf16.mxu0 %v3504_v5 }
 0x25c   :  { %v4254_v59 = vadd.f32 %v987_v56, %v985_v54  ;;  %v988_v60 = vmax.f32 %v976_v57, 0.0  ;;  %v806_v61 = vpop.f32.mrb[28].mxu0  ;;  %3275 = vmatprep.subr.bf16.mxu1 %v3504_v5 }
 0x25d   :  { %v808_v62 = vpop.f32.mrb[29].mxu0  ;;  %v955_v18 = vadd.f32 %v4202_v28, %v806_v61  ;;  %v3484_v61 = vld [vmem:[%s4463_s7 + $0x90] ss:$12 sps:$4 sm:$0xff]  }
 0x25e   :  { %v4258_v0 = vadd.f32 %v988_v60, %v986_v16  ;;  %v965_v2 = vadd.f32 %v953_v58, %v808_v62  ;;  %3292 = vmatpush3.bf16.msra.mxu0 %v3996_v21  ;;  %v810_v17 = vpop.f32.mrb[30].mxu0  ;;  %v3463_v21 = vld [vmem:[%s4463_s7 + $0x4] ss:$12 sps:$4 sm:$0xff]   ;;  %v3487_v62 = vld [vmem:[%s4463_s7 + $0x80] ss:$12 sps:$4 sm:$0xff]  }
 0x25f   :  { %3276 = vmatpush3.bf16.msra.mxu1 %v4015_v22  ;;  %v812_v4 = vpop.f32.mrb[31].mxu0  ;;  %3293 = vmatprep.subr.bf16.mxu0 %v3504_v5  ;;  %v956_v30 = vadd.f32 %v4202_v28, %v810_v17  ;;  %v3491_v17 = vld [vmem:[%s4463_s7 + $0x98] ss:$12 sps:$4 sm:$0xff]  }
 0x260   :  { %v4263_v6 = vadd.f32 %v954_v63, %v812_v4  ;;  %3277 = vmatprep.subr.bf16.mxu1 %v3504_v5 }
 0x262   :  { %3294 = vmatpush3.bf16.msra.mxu0 %v4006_v20  ;;  %v3461_v20 = vld [vmem:[%s4463_s7] ss:$12 sps:$4 sm:$0xff]  }
 0x263   :  { %3278 = vmatpush3.bf16.msra.mxu1 %v4025_v19  ;;  %3295 = vmatprep.subr.bf16.mxu0 %v3504_v5 }
 0x264   :  { %3279 = vmatprep.subr.bf16.mxu1 %v3504_v5 }
 0x266   :  { %3296 = vmatpush3.bf16.msra.mxu0 %v4015_v22  ;;  %v3464_v22 = vld [vmem:[%s4463_s7 + $0x18] ss:$12 sps:$4 sm:$0xff]  }
 0x267   :  { %3280 = vmatpush3.bf16.msra.mxu1 %v4034_v25  ;;  %3297 = vmatprep.subr.bf16.mxu0 %v3504_v5 }
 0x268   :  { %1930 = vmatprep.subr.bf16.mxu1 %v3463_v21 }
 0x26a   :  { %3282 = vmatmul.mubr.msk.bf16.vlgmr.msra.gmra.mrb[52].mxu1 %vm2603_vm12, %v3512_v27  ;;  %3298 = vmatpush3.bf16.msra.mxu0 %v4025_v19  ;;  %v3468_v19 = vld [vmem:[%s4463_s7 + $0x30] ss:$12 sps:$4 sm:$0xff]  }
 0x26b   :  { %3299 = vmatprep.subr.bf16.mxu0 %v3504_v5  ;;  %1931 = vmatpush1.bf16.msra.mxu1 %v3461_v20 }
 0x26c   :  { %1932 = vmatprep.subr.bf16.mxu1 %v3466_v9  ;;  %1962 = vmatprep.mubr.bf16.mxu1 %v3503_v1 }
 0x26e   :  { %3300 = vmatpush3.bf16.msra.mxu0 %v4034_v25  ;;  %v3475_v25 = vld [vmem:[%s4463_s7 + $0x38] ss:$12 sps:$4 sm:$0xff]  }
 0x26f   :  { %1933 = vmatpush1.bf16.msra.mxu1 %v3464_v22  ;;  %3305 = vmatprep.subr.bf16.mxu0 %v3467_v11 }
 0x270   :  { %1934 = vmatprep.subr.bf16.mxu1 %v3470_v12 }
 0x271   :  { %3302 = vmatmul.mubr.msk.bf16.vlgmr.msra.gmra.mrb[68].mxu0 %vm2607_vm15, %v3512_v27 }
 0x272   :  { %3306 = vmatpush3.bf16.msra.mxu0 %v3467_v11 }
 0x273   :  { %1935 = vmatpush1.bf16.msra.mxu1 %v3468_v19  ;;  %3307 = vmatprep.subr.bf16.mxu0 %v3471_v13 }
 0x274   :  { %v816_v23 = vpop.f32.mrb[32].mxu0  ;;  %1936 = vmatprep.subr.bf16.mxu1 %v3474_v15 }
 0x275   :  { %v818_v27 = vpop.f32.mrb[33].mxu0  ;;  %v3059_v29 = vpop.f32.mrb[24].mxu1  ;;  %v957_v50 = vadd.f32 %v4202_v28, %v816_v23 }
 0x276   :  { %v967_v31 = vadd.f32 %v955_v18, %v818_v27  ;;  %v820_v32 = vpop.f32.mrb[34].mxu0  ;;  %v911_v33 = vpop.f32.mrb[25].mxu1  ;;  %3308 = vmatpush3.bf16.msra.mxu0 %v3471_v13 }
 0x277   :  { %v977_v34 = vadd.f32 %v965_v2, %v911_v33  ;;  %v822_v35 = vpop.f32.mrb[35].mxu0  ;;  %v3060_v36 = vpop.f32.mrb[26].mxu1  ;;  %1937 = vmatpush1.bf16.msra.mxu1 %v3472_v24  ;;  %3309 = vmatprep.subr.bf16.mxu0 %v3475_v25  ;;  %v958_v57 = vadd.f32 %v4202_v28, %v820_v32  ;;  %v3488_v2 = vld [vmem:[%s4463_s7 + $0xa8] ss:$12 sps:$4 sm:$0xff]  }
 0x278   :  { %v979_v39 = vadd.f32 %v3059_v29, %v967_v31  ;;  %v968_v40 = vadd.f32 %v956_v30, %v822_v35  ;;  %v914_v41 = vpop.f32.mrb[27].mxu1  ;;  %1938 = vmatprep.subr.bf16.mxu1 %v3478_v26 }
 0x279   :  { %v989_v43 = vmax.f32 %v977_v34, 0.0  ;;  %v978_v44 = vadd.f32 %v4263_v6, %v914_v41 }
 0x27a   :  { %v991_v45 = vmax.f32 %v979_v39, 0.0  ;;  %v980_v46 = vadd.f32 %v3060_v36, %v968_v40  ;;  %3310 = vmatpush3.bf16.msra.mxu0 %v3475_v25  ;;  %v2644_v36 = vld [vmem:[%s4465_s11] ss:$0 sm:$0xff] }
 0x27b   :  { %v998_v14 = vadd.f32 %v4254_v59, %v989_v43  ;;  %v990_v47 = vmax.f32 %v978_v44, 0.0  ;;  %1939 = vmatpush1.bf16.msra.mxu1 %v3476_v37  ;;  %3311 = vmatprep.subr.bf16.mxu0 %v3479_v38 }
 0x27c   :  { %v992_v51 = vmax.f32 %v980_v46, 0.0  ;;  %v826_v52 = vpop.f32.mrb[36].mxu0  ;;  %1940 = vmatprep.subr.bf16.mxu1 %v3482_v42 }
 0x27d   :  { %v1003_v54 = vadd.f32 %v4258_v0, %v990_v47  ;;  %v828_v55 = vpop.f32.mrb[37].mxu0  ;;  %v999_v56 = vadd.f32 %v998_v14, %v991_v45  ;;  %v3490_v0 = vld [vmem:[%s4463_s7 + $0xac] ss:$12 sps:$4 sm:$0xff]   ;;  %v959_v4 = vadd.f32 %v4202_v28, %v826_v52  ;;  %v3495_v52 = vld [vmem:[%s4466_s9 + $0x10] sm:$0xff]  }
 0x27e   :  { %v969_v16 = vadd.f32 %v957_v50, %v828_v55  ;;  %v830_v58 = vpop.f32.mrb[38].mxu0  ;;  %3312 = vmatpush3.bf16.msra.mxu0 %v3479_v38  ;;  %v3493_v50 = vld [vmem:[%s4466_s9] sm:$0xff]  }
 0x27f   :  { %v832_v59 = vpop.f32.mrb[39].mxu0  ;;  %1941 = vmatpush1.bf16.msra.mxu1 %v3480_v48  ;;  %v1004_v60 = vadd.f32 %v1003_v54, %v992_v51  ;;  %3313 = vmatprep.subr.bf16.mxu0 %v3483_v49  ;;  %v960_v21 = vadd.f32 %v4202_v28, %v830_v58  ;;  %v3494_v51 = vld [vmem:[%s4466_s9 + $0x8] sm:$0xff]  }
 0x280   :  { %v970_v63 = vadd.f32 %v958_v57, %v832_v59  ;;  %1942 = vmatprep.subr.bf16.mxu1 %v3486_v53  ;;  %v3496_v53 = vld [vmem:[%s4466_s9 + $0x18] sm:$0xff]  }
 0x282   :  { %3314 = vmatpush3.bf16.msra.mxu0 %v3483_v49 }
 0x283   :  { %1943 = vmatpush1.bf16.msra.mxu1 %v3484_v61  ;;  %3315 = vmatprep.subr.bf16.mxu0 %v3487_v62 }
 0x284   :  { %1944 = vmatprep.subr.bf16.mxu1 %v3490_v0 }
 0x286   :  { %3316 = vmatpush3.bf16.msra.mxu0 %v3487_v62 }
 0x287   :  { %1945 = vmatpush1.bf16.msra.mxu1 %v3488_v2  ;;  %3317 = vmatprep.subr.bf16.mxu0 %v3491_v17  ;;  %v3499_v2 = vld [vmem:[%s4466_s9 + $0x30] sm:$0xff]  }
 0x28a   :  { %3318 = vmatpush3.bf16.msra.mxu0 %v3491_v17  ;;  %v3500_v17 = vld [vmem:[%s4466_s9 + $0x38] sm:$0xff]  }
 0x28b   :  { %3319 = vmatprep.subr.bf16.mxu0 %v3492_v3 }
 0x28e   :  { %3320 = vmatpush3.bf16.msra.mxu0 %v3492_v3 }
 0x28f   :  { %3345 = vmatprep.subr.bf16.mxu0 %v3504_v5 }
 0x294   :  { %v836_v6 = vpop.f32.mrb[40].mxu0 }
 0x295   :  { %v837_v7 = vpop.f32.mrb[41].mxu0  ;;  %v3063_v8 = vpop.f32.mrb[28].mxu1 }
 0x296   :  { %v971_v20 = vadd.f32 %v959_v4, %v837_v7  ;;  %v839_v9 = vpop.f32.mrb[42].mxu0  ;;  %v927_v10 = vpop.f32.mrb[29].mxu1 }
 0x297   :  { %v981_v22 = vadd.f32 %v969_v16, %v927_v10  ;;  %v840_v11 = vpop.f32.mrb[43].mxu0  ;;  %v3064_v12 = vpop.f32.mrb[30].mxu1 }
 0x298   :  { %v983_v19 = vadd.f32 %v3063_v8, %v971_v20  ;;  %v972_v13 = vadd.f32 %v960_v21, %v840_v11  ;;  %v930_v15 = vpop.f32.mrb[31].mxu1 }
 0x299   :  { %v993_v24 = vmax.f32 %v981_v22, 0.0  ;;  %v982_v25 = vadd.f32 %v970_v63, %v930_v15 }
 0x29a   :  { %v995_v18 = vmax.f32 %v983_v19, 0.0  ;;  %v984_v23 = vadd.f32 %v3064_v12, %v972_v13 }
 0x29b   :  { %v1000_v26 = vadd.f32 %v999_v56, %v993_v24  ;;  %v994_v27 = vmax.f32 %v982_v25, 0.0  ;;  %v3497_v56 = vld [vmem:[%s4466_s9 + $0x20] sm:$0xff]  }
 0x29c   :  { %v996_v29 = vmax.f32 %v984_v23, 0.0  ;;  %v844_v30 = vpop.f32.mrb[44].mxu0 }
 0x29d   :  { %v1005_v31 = vadd.f32 %v1004_v60, %v994_v27  ;;  %v845_v32 = vpop.f32.mrb[45].mxu0  ;;  %v1122_v28 = vpop.f32.mrb[32].mxu1  ;;  %v1001_v33 = vadd.f32 %v1000_v26, %v995_v18  ;;  %v3498_v60 = vld [vmem:[%s4466_s9 + $0x28] sm:$0xff]  }
 0x29e   :  { %v846_v34 = vpop.f32.mrb[46].mxu0  ;;  %v3083_v35 = vpop.f32.mrb[33].mxu1 }
 0x29f   :  { %v847_v37 = vpop.f32.mrb[47].mxu0  ;;  %v1125_v38 = vpop.f32.mrb[34].mxu1  ;;  %v1007_v39 = vmul.f32 0.16666667, %v1001_v33  ;;  %v1006_v40 = vadd.f32 %v1005_v31, %v996_v29 }
 0x2a0   :  { %v1129_v41 = vpack.c.bf16 %v1125_v38, %v1122_v28  ;;  %v3084_v42 = vpop.f32.mrb[35].mxu1 }
 0x2a1   :  { %v2436_v43 = vmul.f32 %v2644_v36, %v1007_v39  ;;  %v1008_v44 = vmul.f32 0.16666667, %v1006_v40 }
 0x2a2   :  { %1963 = vmatmul.mubr.bf16.vlgmr.msra.gmra.mrb[56].mxu1 %v1129_v41  ;;  %3321 = vmatprep.mubr.bf16.mxu0 %v1129_v41 }
 0x2a3   :  { %2438 = vadd.xlane.f32.xlu0 %v2436_v43  ;;  %v2437_v45 = vmul.f32 %v2644_v36, %v1008_v44  ;;  %1970 = vmatprep.mubr.bf16.mxu1 %v3503_v1 }
 0x2a4   :  { %v1178_v46 = vpop.f32.mrb[48].mxu0 }
 0x2a5   :  { %2440 = vadd.xlane.f32.xlu1 %v2437_v45  ;;  %v3103_v14 = vpop.f32.mrb[49].mxu0 }
 0x2a6   :  { %v1181_v47 = vpop.f32.mrb[50].mxu0  ;;  %v3501_v14 = vld [vmem:[%s4467_s2] sm:$0xff]  }
 0x2a7   :  { %v1185_v48 = vpack.c.bf16 %v1181_v47, %v1178_v46  ;;  %v3104_v49 = vpop.f32.mrb[51].mxu0 }
 0x2a9   :  { %3322 = vmatmul.mubr.bf16.vlgmr.msra.gmra.mrb[72].mxu0 %v1185_v48 }
 0x2aa   :  { %1971 = vmatmul.mubr.bf16.gmra.mrb[60].mxu1 %v1185_v48  ;;  %3346 = vmatpush3.bf16.msra.mxu0 %v3493_v50 }
 0x2ab   :  { %1980 = vmatprep.mubr.bf16.mxu1 %v3503_v1  ;;  %3347 = vmatprep.subr.bf16.mxu0 %v3504_v5 }
 0x2ae   :  { %3348 = vmatpush3.bf16.msra.mxu0 %v3494_v51 }
 0x2af   :  { %3349 = vmatprep.subr.bf16.mxu0 %v3504_v5 }
 0x2b2   :  { %3350 = vmatpush3.bf16.msra.mxu0 %v3495_v52 }
 0x2b3   :  { %3351 = vmatprep.subr.bf16.mxu0 %v3504_v5 }
 0x2b6   :  { %3352 = vmatpush3.bf16.msra.mxu0 %v3496_v53 }
 0x2b7   :  { %3353 = vmatprep.subr.bf16.mxu0 %v3504_v5 }
 0x2ba   :  { %3354 = vmatpush3.bf16.msra.mxu0 %v3497_v56 }
 0x2bb   :  { %3355 = vmatprep.subr.bf16.mxu0 %v3504_v5 }
 0x2bd   :  { %v1235_v54 = vpop.f32.mrb[36].mxu1 }
 0x2be   :  { %v3123_v55 = vpop.f32.mrb[37].mxu1  ;;  %3356 = vmatpush3.bf16.msra.mxu0 %v3498_v60 }
 0x2bf   :  { %v1238_v57 = vpop.f32.mrb[38].mxu1  ;;  %3357 = vmatprep.subr.bf16.mxu0 %v3504_v5 }
 0x2c0   :  { %v1242_v16 = vpack.c.bf16 %v1238_v57, %v1235_v54  ;;  %v3124_v58 = vpop.f32.mrb[39].mxu1 }
 0x2c2   :  { %1981 = vmatmul.mubr.bf16.gmra.mrb[64].mxu1 %v1242_v16  ;;  %3325 = vmatprep.mubr.bf16.mxu0 %v1242_v16 }
 0x2c3   :  { %1990 = vmatprep.mubr.bf16.mxu1 %v3503_v1  ;;  %3358 = vmatpush3.bf16.msra.mxu0 %v3499_v2 }
 0x2c4   :  { %v1292_v59 = vpop.f32.mrb[52].mxu0  ;;  %3359 = vmatprep.subr.bf16.mxu0 %v3504_v5 }
 0x2c5   :  { %v3143_v61 = vpop.f32.mrb[53].mxu0 }
 0x2c6   :  { %v1295_v62 = vpop.f32.mrb[54].mxu0 }
 0x2c7   :  { %v1299_v63 = vpack.c.bf16 %v1295_v62, %v1292_v59  ;;  %v3144_v0 = vpop.f32.mrb[55].mxu0  ;;  %3360 = vmatpush3.bf16.msra.mxu0 %v3500_v17 }
 0x2c9   :  { %3326 = vmatmul.mubr.bf16.gmra.mrb[76].mxu0 %v1299_v63 }
 0x2ca   :  { %1991 = vmatmul.mubr.bf16.gmra.mrb[68].mxu1 %v1299_v63 }
 0x2cb   :  { %2000 = vmatprep.mubr.bf16.mxu1 %v3503_v1 }
 0x2dd   :  { %v1349_v3 = vpop.f32.mrb[40].mxu1 }
 0x2de   :  { %v3163_v4 = vpop.f32.mrb[41].mxu1 }
 0x2df   :  { %v1352_v6 = vpop.f32.mrb[42].mxu1 }
 0x2e0   :  { %v1356_v7 = vpack.c.bf16 %v1352_v6, %v1349_v3  ;;  %v3164_v8 = vpop.f32.mrb[43].mxu1 }
 0x2e2   :  { %2001 = vmatmul.mubr.bf16.gmra.mrb[72].mxu1 %v1356_v7  ;;  %3329 = vmatprep.mubr.bf16.mxu0 %v1356_v7 }
 0x2e3   :  { %2010 = vmatprep.mubr.bf16.mxu1 %v3503_v1 }
 0x2e4   :  { %v1406_v21 = vpop.f32.mrb[56].mxu0 }
 0x2e5   :  { %v3183_v20 = vpop.f32.mrb[57].mxu0 }
 0x2e6   :  { %v1409_v9 = vpop.f32.mrb[58].mxu0 }
 0x2e7   :  { %v1413_v10 = vpack.c.bf16 %v1409_v9, %v1406_v21  ;;  %v3184_v22 = vpop.f32.mrb[59].mxu0 }
 0x2e9   :  { %3330 = vmatmul.mubr.bf16.gmra.mrb[80].mxu0 %v1413_v10 }
 0x2ea   :  { %2011 = vmatmul.mubr.bf16.gmra.mrb[76].mxu1 %v1413_v10 }
 0x2eb   :  { %2020 = vmatprep.mubr.bf16.mxu1 %v3503_v1 }
 0x2fd   :  { %v1463_v11 = vpop.f32.mrb[44].mxu1 }
 0x2fe   :  { %v3203_v12 = vpop.f32.mrb[45].mxu1 }
 0x2ff   :  { %v1466_v19 = vpop.f32.mrb[46].mxu1 }
 0x300   :  { %v1470_v13 = vpack.c.bf16 %v1466_v19, %v1463_v11  ;;  %v3204_v15 = vpop.f32.mrb[47].mxu1 }
 0x302   :  { %2021 = vmatmul.mubr.bf16.gmra.mrb[80].mxu1 %v1470_v13  ;;  %3333 = vmatprep.mubr.bf16.mxu0 %v1470_v13 }
 0x303   :  { %2030 = vmatprep.mubr.bf16.mxu1 %v3503_v1 }
 0x304   :  { %v1520_v24 = vpop.f32.mrb[60].mxu0 }
 0x305   :  { %v3223_v25 = vpop.f32.mrb[61].mxu0 }
 0x306   :  { %v1523_v18 = vpop.f32.mrb[62].mxu0 }
 0x307   :  { %v1527_v23 = vpack.c.bf16 %v1523_v18, %v1520_v24  ;;  %v3224_v26 = vpop.f32.mrb[63].mxu0 }
 0x309   :  { %3334 = vmatmul.mubr.bf16.gmra.mrb[84].mxu0 %v1527_v23 }
 0x30a   :  { %2031 = vmatmul.mubr.bf16.gmra.mrb[84].mxu1 %v1527_v23 }
 0x30b   :  { %2040 = vmatprep.mubr.bf16.mxu1 %v3503_v1 }
 0x31d   :  { %v1577_v27 = vpop.f32.mrb[48].mxu1 }
 0x31e   :  { %v3243_v29 = vpop.f32.mrb[49].mxu1 }
 0x31f   :  { %v1580_v30 = vpop.f32.mrb[50].mxu1 }
 0x320   :  { %v1584_v31 = vpack.c.bf16 %v1580_v30, %v1577_v27  ;;  %v3244_v32 = vpop.f32.mrb[51].mxu1 }
 0x322   :  { %2041 = vmatmul.mubr.bf16.gmra.mrb[88].mxu1 %v1584_v31  ;;  %3337 = vmatprep.mubr.bf16.mxu0 %v1584_v31 }
 0x323   :  { %2050 = vmatprep.mubr.bf16.mxu1 %v3503_v1 }
 0x324   :  { %v1634_v28 = vpop.f32.mrb[64].mxu0 }
 0x325   :  { %v3263_v33 = vpop.f32.mrb[65].mxu0 }
 0x326   :  { %v1637_v34 = vpop.f32.mrb[66].mxu0 }
 0x327   :  { %v1641_v35 = vpack.c.bf16 %v1637_v34, %v1634_v28  ;;  %v3264_v36 = vpop.f32.mrb[67].mxu0 }
 0x329   :  { %3338 = vmatmul.mubr.bf16.gmra.mrb[88].mxu0 %v1641_v35 }
 0x32a   :  { %2051 = vmatmul.mubr.bf16.gmra.mrb[92].mxu1 %v1641_v35 }
 0x32b   :  { %2060 = vmatprep.mubr.bf16.mxu1 %v3503_v1 }
 0x33d   :  { %v1691_v37 = vpop.f32.mrb[52].mxu1 }
 0x33e   :  { %v3283_v38 = vpop.f32.mrb[53].mxu1 }
 0x33f   :  { %v1694_v39 = vpop.f32.mrb[54].mxu1 }
 0x340   :  { %v1698_v40 = vpack.c.bf16 %v1694_v39, %v1691_v37  ;;  %v3284_v41 = vpop.f32.mrb[55].mxu1 }
 0x342   :  { %2061 = vmatmul.mubr.bf16.gmra.mrb[96].mxu1 %v1698_v40  ;;  %3341 = vmatprep.mubr.bf16.mxu0 %v1698_v40 }
 0x343   :  { %2068 = vmatprep.mubr.bf16.mxu1 %v3503_v1  ;;  %v4418_v1 = vld [vmem:[%s4468_s8] ss:$0 sm:$0xff] }
 0x344   :  { %v1748_v42 = vpop.f32.mrb[68].mxu0 }
 0x345   :  { %v3303_v43 = vpop.f32.mrb[69].mxu0 }
 0x346   :  { %v1751_v44 = vpop.f32.mrb[70].mxu0 }
 0x347   :  { %v1755_v45 = vpack.c.bf16 %v1751_v44, %v1748_v42  ;;  %v3304_v46 = vpop.f32.mrb[71].mxu0 }
 0x349   :  { %3342 = vmatmul.mubr.bf16.gmra.mrb[92].mxu0 %v1755_v45 }
 0x34a   :  { %2069 = vmatmul.mubr.bf16.gmra.mrb[100].mxu1 %v1755_v45  ;;  %3361 = vmatprep.mubr.msk.bf16.mxu0 %vm3506_vm0, %v3504_v5  ;;  %vm2481_vm0 = vcmask 7168  }
 0x351   :  { %3362 = vmatmul.mubr.bf16.vlgmr.msra.gmra.mrb[96].mxu0 %v3501_v14 }
 0x375   :  { %v1964_v47 = vpop.f32.mrb[56].mxu1 }
 0x376   :  { %v1966_v48 = vpop.f32.mrb[57].mxu1  ;;  %v2207_v52 = vadd.f32 %v4418_v1, %v1964_v47 }
 0x377   :  { %v1967_v49 = vpop.f32.mrb[58].mxu1 }
 0x378   :  { %v1969_v50 = vpop.f32.mrb[59].mxu1  ;;  %v2208_v56 = vadd.f32 %v4418_v1, %v1967_v49 }
 0x37c   :  { %v3323_v51 = vpop.f32.mrb[72].mxu0 }
 0x37d   :  { %v1972_v53 = vpop.f32.mrb[60].mxu1  ;;  %v2109_v54 = vpop.f32.mrb[73].mxu0 }
 0x37e   :  { %v1974_v5 = vpop.f32.mrb[61].mxu1  ;;  %v3324_v55 = vpop.f32.mrb[74].mxu0  ;;  %v2209_v61 = vadd.f32 %v4418_v1, %v1972_v53 }
 0x37f   :  { %v2227_v57 = vadd.f32 %v2207_v52, %v1974_v5  ;;  %v1976_v16 = vpop.f32.mrb[62].mxu1  ;;  %v2111_v58 = vpop.f32.mrb[75].mxu0 }
 0x380   :  { %v1978_v59 = vpop.f32.mrb[63].mxu1  ;;  %v2210_v0 = vadd.f32 %v4418_v1, %v1976_v16 }
 0x381   :  { %v2228_v60 = vadd.f32 %v2208_v56, %v1978_v59 }
 0x395   :  { %v1982_v62 = vpop.f32.mrb[64].mxu1 }
 0x396   :  { %v1984_v63 = vpop.f32.mrb[65].mxu1  ;;  %v2211_v7 = vadd.f32 %v4418_v1, %v1982_v62 }
 0x397   :  { %v2229_v2 = vadd.f32 %v2209_v61, %v1984_v63  ;;  %v1986_v17 = vpop.f32.mrb[66].mxu1 }
 0x398   :  { %v1988_v3 = vpop.f32.mrb[67].mxu1  ;;  %v2212_v11 = vadd.f32 %v4418_v1, %v1986_v17 }
 0x399   :  { %v2230_v4 = vadd.f32 %v2210_v0, %v1988_v3 }
 0x39c   :  { %v3327_v6 = vpop.f32.mrb[76].mxu0 }
 0x39d   :  { %v2249_v8 = vadd.f32 %v3327_v6, %v2229_v2  ;;  %v1992_v21 = vpop.f32.mrb[68].mxu1  ;;  %v2121_v20 = vpop.f32.mrb[77].mxu0 }
 0x39e   :  { %v2247_v9 = vadd.f32 %v2227_v57, %v2121_v20  ;;  %v1994_v10 = vpop.f32.mrb[69].mxu1  ;;  %v3328_v22 = vpop.f32.mrb[78].mxu0  ;;  %v2213_v32 = vadd.f32 %v4418_v1, %v1992_v21 }
 0x39f   :  { %v2269_v12 = vmax.f32 %v2249_v8, 0.0  ;;  %v2231_v19 = vadd.f32 %v2211_v7, %v1994_v10  ;;  %v2250_v13 = vadd.f32 %v3328_v22, %v2230_v4  ;;  %v1996_v15 = vpop.f32.mrb[70].mxu1  ;;  %v2124_v24 = vpop.f32.mrb[79].mxu0 }
 0x3a0   :  { %v2267_v25 = vmax.f32 %v2247_v9, 0.0  ;;  %v2248_v18 = vadd.f32 %v2228_v60, %v2124_v24  ;;  %v1998_v23 = vpop.f32.mrb[71].mxu1  ;;  %v2214_v34 = vadd.f32 %v4418_v1, %v1996_v15 }
 0x3a1   :  { %v2270_v26 = vmax.f32 %v2250_v13, 0.0  ;;  %v2232_v27 = vadd.f32 %v2212_v11, %v1998_v23 }
 0x3a2   :  { %v2287_v29 = vadd.f32 %v2269_v12, %v2267_v25  ;;  %v2268_v30 = vmax.f32 %v2248_v18, 0.0 }
 0x3a4   :  { %v2296_v31 = vadd.f32 %v2270_v26, %v2268_v30 }
 0x3b5   :  { %v2002_v28 = vpop.f32.mrb[72].mxu1 }
 0x3b6   :  { %v2004_v33 = vpop.f32.mrb[73].mxu1  ;;  %v2215_v40 = vadd.f32 %v4418_v1, %v2002_v28 }
 0x3b7   :  { %v2233_v35 = vadd.f32 %v2213_v32, %v2004_v33  ;;  %v2006_v36 = vpop.f32.mrb[74].mxu1 }
 0x3b8   :  { %v2008_v37 = vpop.f32.mrb[75].mxu1  ;;  %v2216_v14 = vadd.f32 %v4418_v1, %v2006_v36 }
 0x3b9   :  { %v2234_v38 = vadd.f32 %v2214_v34, %v2008_v37 }
 0x3bc   :  { %v3331_v39 = vpop.f32.mrb[80].mxu0 }
 0x3bd   :  { %v2253_v41 = vadd.f32 %v3331_v39, %v2233_v35  ;;  %v2012_v42 = vpop.f32.mrb[76].mxu1  ;;  %v2137_v43 = vpop.f32.mrb[81].mxu0 }
 0x3be   :  { %v2251_v44 = vadd.f32 %v2231_v19, %v2137_v43  ;;  %v2014_v45 = vpop.f32.mrb[77].mxu1  ;;  %v3332_v46 = vpop.f32.mrb[82].mxu0  ;;  %v2217_v60 = vadd.f32 %v4418_v1, %v2012_v42 }
 0x3bf   :  { %v2235_v47 = vadd.f32 %v2215_v40, %v2014_v45  ;;  %v2254_v48 = vadd.f32 %v3332_v46, %v2234_v38  ;;  %v2016_v49 = vpop.f32.mrb[78].mxu1  ;;  %v2140_v50 = vpop.f32.mrb[83].mxu0  ;;  %v2273_v5 = vmax.f32 %v2253_v41, 0.0 }
 0x3c0   :  { %v2271_v51 = vmax.f32 %v2251_v44, 0.0  ;;  %v2252_v52 = vadd.f32 %v2232_v27, %v2140_v50  ;;  %v2018_v53 = vpop.f32.mrb[79].mxu1  ;;  %v2218_v63 = vadd.f32 %v4418_v1, %v2016_v49 }
 0x3c1   :  { %v2236_v54 = vadd.f32 %v2216_v14, %v2018_v53  ;;  %v2274_v57 = vmax.f32 %v2254_v48, 0.0 }
 0x3c2   :  { %v2288_v55 = vadd.f32 %v2287_v29, %v2271_v51  ;;  %v2272_v56 = vmax.f32 %v2252_v52, 0.0 }
 0x3c4   :  { %v2297_v16 = vadd.f32 %v2296_v31, %v2272_v56  ;;  %v2289_v58 = vadd.f32 %v2288_v55, %v2273_v5 }
 0x3c6   :  { %v2298_v59 = vadd.f32 %v2297_v16, %v2274_v57 }
 0x3d5   :  { %v2022_v61 = vpop.f32.mrb[80].mxu1 }
 0x3d6   :  { %v2024_v62 = vpop.f32.mrb[81].mxu1  ;;  %v2219_v6 = vadd.f32 %v4418_v1, %v2022_v61 }
 0x3d7   :  { %v2237_v0 = vadd.f32 %v2217_v60, %v2024_v62  ;;  %v2026_v2 = vpop.f32.mrb[82].mxu1 }
 0x3d8   :  { %v2028_v17 = vpop.f32.mrb[83].mxu1  ;;  %v2220_v22 = vadd.f32 %v4418_v1, %v2026_v2 }
 0x3d9   :  { %v2238_v3 = vadd.f32 %v2218_v63, %v2028_v17 }
 0x3dc   :  { %v3335_v4 = vpop.f32.mrb[84].mxu0 }
 0x3dd   :  { %v2257_v7 = vadd.f32 %v3335_v4, %v2237_v0  ;;  %v2032_v8 = vpop.f32.mrb[84].mxu1  ;;  %v2153_v21 = vpop.f32.mrb[85].mxu0 }
 0x3de   :  { %v2255_v20 = vadd.f32 %v2235_v47, %v2153_v21  ;;  %v2034_v9 = vpop.f32.mrb[85].mxu1  ;;  %v3336_v10 = vpop.f32.mrb[86].mxu0  ;;  %v2221_v28 = vadd.f32 %v4418_v1, %v2032_v8 }
 0x3df   :  { %v2239_v11 = vadd.f32 %v2219_v6, %v2034_v9  ;;  %v2258_v12 = vadd.f32 %v3336_v10, %v2238_v3  ;;  %v2036_v19 = vpop.f32.mrb[86].mxu1  ;;  %v2156_v13 = vpop.f32.mrb[87].mxu0  ;;  %v2277_v23 = vmax.f32 %v2257_v7, 0.0 }
 0x3e0   :  { %v2275_v15 = vmax.f32 %v2255_v20, 0.0  ;;  %v2256_v24 = vadd.f32 %v2236_v54, %v2156_v13  ;;  %v2038_v25 = vpop.f32.mrb[87].mxu1  ;;  %v2222_v35 = vadd.f32 %v4418_v1, %v2036_v19 }
 0x3e1   :  { %v2240_v18 = vadd.f32 %v2220_v22, %v2038_v25  ;;  %v2278_v29 = vmax.f32 %v2258_v12, 0.0 }
 0x3e2   :  { %v2290_v26 = vadd.f32 %v2289_v58, %v2275_v15  ;;  %v2276_v27 = vmax.f32 %v2256_v24, 0.0 }
 0x3e4   :  { %v2299_v30 = vadd.f32 %v2298_v59, %v2276_v27  ;;  %v2291_v31 = vadd.f32 %v2290_v26, %v2277_v23 }
 0x3e6   :  { %v2300_v32 = vadd.f32 %v2299_v30, %v2278_v29 }
 0x3f5   :  { %v2042_v33 = vpop.f32.mrb[88].mxu1 }
 0x3f6   :  { %v2044_v34 = vpop.f32.mrb[89].mxu1  ;;  %v2223_v41 = vadd.f32 %v4418_v1, %v2042_v33 }
 0x3f7   :  { %v2241_v36 = vadd.f32 %v2221_v28, %v2044_v34  ;;  %v2046_v37 = vpop.f32.mrb[90].mxu1  ;;  %v2646_v34 = vld [vmem:[%s4471_s13] ss:$0 sm:$0xff] }
 0x3f8   :  { %v2048_v38 = vpop.f32.mrb[91].mxu1  ;;  %v2224_v47 = vadd.f32 %v4418_v1, %v2046_v37 }
 0x3f9   :  { %v2242_v39 = vadd.f32 %v2222_v35, %v2048_v38 }
 0x3fc   :  { %v3339_v40 = vpop.f32.mrb[88].mxu0 }
 0x3fd   :  { %v2261_v42 = vadd.f32 %v3339_v40, %v2241_v36  ;;  %v2052_v43 = vpop.f32.mrb[92].mxu1  ;;  %v2169_v44 = vpop.f32.mrb[89].mxu0 }
 0x3fe   :  { %v2259_v45 = vadd.f32 %v2239_v11, %v2169_v44  ;;  %v2054_v46 = vpop.f32.mrb[93].mxu1  ;;  %v3340_v14 = vpop.f32.mrb[90].mxu0  ;;  %v2225_v61 = vadd.f32 %v4418_v1, %v2052_v43 }
 0x3ff   :  { %v2243_v48 = vadd.f32 %v2223_v41, %v2054_v46  ;;  %v2262_v49 = vadd.f32 %v3340_v14, %v2242_v39  ;;  %v2056_v50 = vpop.f32.mrb[94].mxu1  ;;  %v2172_v51 = vpop.f32.mrb[91].mxu0  ;;  %v2281_v55 = vmax.f32 %v2261_v42, 0.0 }
 0x400   :  { %v2279_v52 = vmax.f32 %v2259_v45, 0.0  ;;  %v2260_v53 = vadd.f32 %v2240_v18, %v2172_v51  ;;  %v2058_v54 = vpop.f32.mrb[95].mxu1  ;;  %v2226_v0 = vadd.f32 %v4418_v1, %v2056_v50  ;;  %v2634_v18 = vld [vmem:[%s4469_s10] ss:$0 sm:$0xff]  ;;  %v20_v45 = vstv %s4472_s14  ;;  %v2439_v46 = vpop.xlane.xlu0 %2438 }
 0x401   :  { %v2244_v5 = vadd.f32 %v2224_v47, %v2058_v54  ;;  %v2282_v16 = vmax.f32 %v2262_v49, 0.0  ;;  %21 = vst [vmem:[#allocation4] sm:$0x1] %v20_v45  ;;  %v2441_v14 = vpop.xlane.xlu1 %2440 }
 0x402   :  { %v2292_v56 = vadd.f32 %v2291_v31, %v2279_v52  ;;  %v2280_v57 = vmax.f32 %v2260_v53, 0.0 }
 0x404   :  { %v2301_v58 = vadd.f32 %v2300_v32, %v2280_v57  ;;  %v2293_v59 = vadd.f32 %v2292_v56, %v2281_v55  ;;  %v2645_v32 = vld [vmem:[%s4470_s12] ss:$0 sm:$0xff] }
 0x406   :  { %v2302_v60 = vadd.f32 %v2301_v58, %v2282_v16 }
 0x408   :  { %v2647_v50 = vld [vmem:[#allocation4] ss:$0 sm:$0xff] }
 0x415   :  { %v2062_v62 = vpop.f32.mrb[96].mxu1 }
 0x416   :  { %v2063_v63 = vpop.f32.mrb[97].mxu1 }
 0x417   :  { %v2245_v2 = vadd.f32 %v2225_v61, %v2063_v63  ;;  %v2065_v17 = vpop.f32.mrb[98].mxu1 }
 0x418   :  { %v2066_v3 = vpop.f32.mrb[99].mxu1 }
 0x419   :  { %v2246_v4 = vadd.f32 %v2226_v0, %v2066_v3 }
 0x41c   :  { %v3343_v6 = vpop.f32.mrb[92].mxu0 }
 0x41d   :  { %v2265_v7 = vadd.f32 %v3343_v6, %v2245_v2  ;;  %v2070_v8 = vpop.f32.mrb[100].mxu1  ;;  %v2185_v21 = vpop.f32.mrb[93].mxu0 }
 0x41e   :  { %v2263_v20 = vadd.f32 %v2243_v48, %v2185_v21  ;;  %v2071_v9 = vpop.f32.mrb[101].mxu1  ;;  %v3344_v10 = vpop.f32.mrb[94].mxu0 }
 0x41f   :  { %v2266_v22 = vadd.f32 %v3344_v10, %v2246_v4  ;;  %v2072_v11 = vpop.f32.mrb[102].mxu1  ;;  %v2188_v12 = vpop.f32.mrb[95].mxu0  ;;  %v2285_v24 = vmax.f32 %v2265_v7, 0.0 }
 0x420   :  { %v2283_v19 = vmax.f32 %v2263_v20, 0.0  ;;  %v2264_v13 = vadd.f32 %v2244_v5, %v2188_v12  ;;  %v2073_v15 = vpop.f32.mrb[103].mxu1 }
 0x421   :  { %v2286_v23 = vmax.f32 %v2266_v22, 0.0 }
 0x422   :  { %v2294_v25 = vadd.f32 %v2293_v59, %v2283_v19  ;;  %v2284_v1 = vmax.f32 %v2264_v13, 0.0 }
 0x424   :  { %v2303_v26 = vadd.f32 %v2302_v60, %v2284_v1  ;;  %v2420_v27 = vpop.f32.mrb[96].mxu0  ;;  %v2295_v29 = vadd.f32 %v2294_v25, %v2285_v24 }
 0x425   :  { %v2421_v30 = vadd.f32 %v2634_v18, %v2420_v27  ;;  %v3363_v31 = vpop.f32.mrb[97].mxu0 }
 0x426   :  { %v2423_v28 = vpop.f32.mrb[98].mxu0  ;;  %v2305_v33 = vmul.f32 0.1, %v2295_v29  ;;  %v2304_v35 = vadd.f32 %v2303_v26, %v2286_v23 }
 0x427   :  { %v2427_v36 = vmax.f32 %v2421_v30, 0.0  ;;  %v3364_v37 = vpop.f32.mrb[99].mxu0  ;;  %v2424_v38 = vadd.f32 %v2634_v18, %v2423_v28 }
 0x428   :  { %v2449_v39 = vmul.f32 %v2645_v32, %v2305_v33  ;;  %v2306_v40 = vmul.f32 0.1, %v2304_v35 }
 0x429   :  { %v2464_v41 = vmul.f32 %v2646_v34, %v2427_v36  ;;  %v2428_v42 = vmax.f32 %v2424_v38, 0.0 }
 0x42a   :  { %2451 = vadd.xlane.f32.xlu0 %v2449_v39  ;;  %v2450_v43 = vmul.f32 %v2645_v32, %v2306_v40 }
 0x42b   :  { %2466 = vadd.xlane.f32.xlu1 %v2464_v41  ;;  %v2465_v44 = vmul.f32 %v2646_v34, %v2428_v42 }
 0x42e   :  { %2453 = vadd.xlane.f32.xlu0 %v2450_v43 }
 0x432   :  { %2468 = vadd.xlane.f32.xlu0 %v2465_v44 }
 0x4b7   :  { %v2452_v47 = vpop.xlane.xlu0 %2451 }
 0x4b8   :  { %v2455_v48 = vadd.f32 %v2452_v47, %v2439_v46  ;;  %v2467_v49 = vpop.xlane.xlu1 %2466 }
 0x4ba   :  { %v2470_v51 = vadd.f32 %v2467_v49, %v2455_v48 }
 0x4bb   :  { %v2454_v52 = vpop.xlane.xlu0 %2453 }
 0x4bc   :  { %v2479_v53 = vadd.f32 %v2647_v50, %v2470_v51  ;;  %v2456_v54 = vadd.f32 %v2454_v52, %v2441_v14 }
 0x4be   :  { %2482 = vst.msk [vmem:[%s4473_s15] sm:$0xff] %vm2481_vm0, %v2479_v53 }
 0x4bf   :  { %v2469_v5 = vpop.xlane.xlu0 %2468 }
 0x4c0   :  { %v2471_v55 = vadd.f32 %v2469_v5, %v2456_v54 }
 0x4c2   :  { %v2480_v56 = vadd.f32 %v2647_v50, %v2471_v55 }
 0x4c4   :  { %2483 = vst.msk [vmem:[%s4473_s15 + $0x8] sm:$0xff] %vm2481_vm0, %v2480_v56 }

</bundles_post_ra>
